<compile_context>
chip_gen: v7x
topology: tpu7x:2x2x1
jax: 0.10.0
libtpu: 0.0.40
codegen_flags: <defaults>
</compile_context>

<pallas_src>
import functools

import jax
import jax.numpy as jnp
from jax.experimental import pallas as pl
from jax.experimental.pallas import tpu as pltpu

EPS = 1e-5  # torch.nn.LayerNorm default


def _expand_shuffle_ln_kernel(x_ref, wpT_ref, wmT_ref, m_ref, g_ref, b_ref,
                              o_ref, *, t_bh, w_pix, p, cdt, inv_cout):
    """One row-tile step: expand (Linear), chunk-LayerNorm, pixel-shuffled store.

    x_ref:   (t_bh * w_pix, C)     input pixels, original dtype (cast in-kernel)
    wpT_ref: (p, C, C)             per-p1 expand weight slices, y_q = x @ wpT[q]
    wmT_ref: (p, C, C)             folded mean weights, mean_q = x @ wmT[q]
    m_ref:   (C, C)                block-ones segment-sum matrix (compute dtype)
    g_ref, b_ref: (1, C) f32       gamma/beta tiled over the p2 chunks
    o_ref:   (t_bh, p, w_pix, C)   output rows in the final pixel-shuffled layout
    """
    xv = x_ref[...]
    if cdt is not None:
        # In-kernel cast: free on the VPU and avoids an extra wrapper-side
        # read+write pass over x in HBM.
        xv = xv.astype(cdt)
    mm = m_ref[...]
    g = g_ref[...]
    b = b_ref[...]

    for q in range(p):  # static unroll over the p1 quarters
        # Expand matmul and folded-mean matmul, both f32-accumulated on the MXU.
        y = jnp.dot(xv, wpT_ref[q], preferred_element_type=jnp.float32)
        mu = jnp.dot(xv, wmT_ref[q], preferred_element_type=jnp.float32)
        d = y - mu
        d2 = d * d
        if cdt is not None:
            # Keep the variance matmul off the (emulated) f32 MXU path; the
            # segment matrix is exact ones and 1/c_out is applied in f32 below.
            d2 = d2.astype(cdt)
        var = jnp.dot(d2, mm, preferred_element_type=jnp.float32) * inv_cout
        out = d * jax.lax.rsqrt(var + EPS) * g + b
        # (t_bh*w_pix, C) -> (t_bh, w_pix, C): pure leading-dim split (layout
        # preserving); stored into the q-th p1 slice of the output block.
        o_ref[:, q, :, :] = out.reshape(t_bh, w_pix, out.shape[-1]).astype(o_ref.dtype)


def make_final_patch_expand2d_params(w, gamma, beta, *, dim_scale=4,
                                     compute_dtype=jnp.bfloat16):
    """Precompute kernel operands once (hoisted out of the per-call path).

    w:           (dim_scale*C, C)  = nn.Linear(C, dim_scale*C, bias=False).weight
    gamma, beta: (C // dim_scale,) LayerNorm affine parameters.
    compute_dtype: dtype fed to the MXU (None = keep f32 end to end).
    """
    four_c, C = w.shape
    p = dim_scale
    assert four_c == p * C, (four_c, p, C)
    assert C % p == 0
    c_out = C // p

    # Per-p1 weight slices, transposed so y_q = x @ wpT[q]
    # (channel split of the 4C axis is (p1, p2, c)).
    wpT = jnp.swapaxes(w.reshape(p, C, C), 1, 2).astype(jnp.float32)   # (p, C, C)

    # Block-ones segment matrix over c_out-sized chunks (no 1/c_out baked in,
    # so the compute-dtype copy is exact for any c_out).
    seg = jnp.arange(C) // c_out
    m = (seg[:, None] == seg[None, :]).astype(jnp.float32)             # (C, C)

    # Fold the per-chunk mean into the weight: mean_q = (x @ wpT[q]) @ (M/c_out)
    #                                                  = x @ wmT[q].
    wmT = jnp.einsum("pij,jk->pik", wpT, m) / float(c_out)             # (p, C, C)

    if compute_dtype is not None:
        wpT = wpT.astype(compute_dtype)
        wmT = wmT.astype(compute_dtype)
        m = m.astype(compute_dtype)

    # gamma/beta repeated once per p2 chunk -> length C, applied lane-dense.
    g = jnp.tile(gamma.astype(jnp.float32), p)[None, :]                # (1, C)
    b = jnp.tile(beta.astype(jnp.float32), p)[None, :]                 # (1, C)

    return dict(wpT=wpT, wmT=wmT, m=m, g=g, b=b, dim_scale=p, c_out=c_out,
                compute_dtype=compute_dtype)


def _pick_t_bh(bh, W, target_rows):
    """Pick (b*h) rows per grid step.

    Prefer a divisor of bh (no pad / no unpad slice -> no extra HBM passes)
    with t*W a multiple of 8 (x-block sublane constraint); take the largest
    one not exceeding target_rows.  Fall back to padding only if no divisor
    qualifies.
    """
    divisors = [t for t in range(1, bh + 1) if bh % t == 0 and (t * W) % 8 == 0]
    if divisors:
        under = [t for t in divisors if t <= target_rows] or [min(divisors)]
        t = max(under)
        # Megacore (v7x): prefer >= 2 grid steps when each step still moves a
        # reasonable number of pixels.
        if t == bh and bh > 1:
            multi = [d for d in divisors if d < bh and d * W >= 512]
            if multi:
                t = max(multi)
        return t
    t = max(1, min(target_rows, bh))
    while (t * W) % 8 != 0:
        t += 1
    return t


def final_patch_expand2d(x, params, *, tile_pixels=2048, out_dtype=None):
    """x: (B, H, W, C) -> (B, dim_scale*H, dim_scale*W, C // dim_scale)."""
    B, H, W, C = x.shape
    p = params["dim_scale"]
    c_out = params["c_out"]
    cdt = params["compute_dtype"]
    if out_dtype is None:
        # Production default: bf16 output halves the dominant HBM write stream.
        out_dtype = cdt if cdt is not None else x.dtype

    bh = B * H
    target_rows = max(1, tile_pixels // max(W, 1))
    t_bh = _pick_t_bh(bh, W, target_rows)
    grid_rows = pl.cdiv(bh, t_bh)
    bh_pad = grid_rows * t_bh

    xr = x.reshape(bh, W, C)
    if bh_pad != bh:  # rare fallback; common path is a free reshape only
        xr = jnp.pad(xr, ((0, bh_pad - bh), (0, 0), (0, 0)))
    x_flat = xr.reshape(bh_pad * W, C)          # no dtype cast here (in-kernel)

    rows = t_bh * W
    kernel = functools.partial(_expand_shuffle_ln_kernel, t_bh=t_bh, w_pix=W,
                               p=p, cdt=cdt, inv_cout=1.0 / float(c_out))

    out4 = pl.pallas_call(
        kernel,
        out_shape=jax.ShapeDtypeStruct((bh_pad, p, W, C), out_dtype),
        grid_spec=pltpu.PrefetchScalarGridSpec(
            num_scalar_prefetch=0,
            grid=(grid_rows,),
            in_specs=[
                pl.BlockSpec((rows, C), lambda i: (i, 0)),        # x row tile
                pl.BlockSpec((p, C, C), lambda i: (0, 0, 0)),     # W^T slices
                pl.BlockSpec((p, C, C), lambda i: (0, 0, 0)),     # folded-mean W
                pl.BlockSpec((C, C), lambda i: (0, 0)),           # segment-sum M
                pl.BlockSpec((1, C), lambda i: (0, 0)),           # gamma (tiled)
                pl.BlockSpec((1, C), lambda i: (0, 0)),           # beta  (tiled)
            ],
            # One contiguous HBM slab per step: (t_bh, p, W, C) in memory order
            # b, h, p1, w, p2, c == the pixel-shuffled output layout.
            out_specs=pl.BlockSpec((t_bh, p, W, C), lambda i: (i, 0, 0, 0)),
        ),
        compiler_params=pltpu.CompilerParams(
            dimension_semantics=("parallel",)),
    )(x_flat, params["wpT"], params["wmT"], params["m"], params["g"], params["b"])

    if bh_pad != bh:
        out4 = out4[:bh]
    # (B*H, p1, W, p2*c_out) reshapes for FREE (no transpose) to (B, 4H, 4W, c_out).
    return out4.reshape(B, H * p, W * p, c_out)


def _reference(x, w, gamma, beta, dim_scale=4):
    B, H, W, C = x.shape
    p = dim_scale
    c_out = C // p
    y = jnp.einsum("bhwc,oc->bhwo", x, w,
                   preferred_element_type=jnp.float32)        # Linear, no bias
    y = y.reshape(B, H, W, p, p, c_out)
    y = y.transpose(0, 1, 3, 2, 4, 5).reshape(B, H * p, W * p, c_out)
    mean = jnp.mean(y, axis=-1, keepdims=True)
    var = jnp.mean((y - mean) ** 2, axis=-1, keepdims=True)
    return ((y - mean) * jax.lax.rsqrt(var + EPS)) * gamma + beta


if __name__ == "__main__":
    # dim=32, dim_scale=4  ->  C//4 = 8 output channels, 4x spatial upscaling.
    B, H, W, C = 2, 8, 8, 32
    dim_scale = 4

    key = jax.random.PRNGKey(0)
    kx, kw, kg, kb = jax.random.split(key, 4)
    x = jax.random.normal(kx, (B, H, W, C), dtype=jnp.float32)
    # nn.Linear(C, dim_scale*C, bias=False).weight has shape (4C, C)
    w = jax.random.normal(kw, (dim_scale * C, C), dtype=jnp.float32) * 0.05
    gamma = 1.0 + 0.1 * jax.random.normal(kg, (C // dim_scale,), dtype=jnp.float32)
    beta = 0.1 * jax.random.normal(kb, (C // dim_scale,), dtype=jnp.float32)

    ref = _reference(x, w, gamma, beta, dim_scale=dim_scale)
    out_shape = (B, H * dim_scale, W * dim_scale, C // dim_scale)

    # 1) f32 end-to-end path: validates kernel math against the reference.
    params_f32 = make_final_patch_expand2d_params(
        w, gamma, beta, dim_scale=dim_scale, compute_dtype=None)
    out_f32 = jax.block_until_ready(final_patch_expand2d(x, params_f32))
    assert out_f32.shape == out_shape, out_f32.shape
    assert out_f32.dtype == jnp.float32, out_f32.dtype
    assert jnp.allclose(out_f32, ref, atol=1e-2, rtol=1e-2), \
        float(jnp.max(jnp.abs(out_f32 - ref)))

    # 2) Production default: bf16 MXU feed + bf16 output stream (halves the
    #    dominant HBM write traffic); tolerance loosened for bf16 quantization.
    params_bf16 = make_final_patch_expand2d_params(
        w, gamma, beta, dim_scale=dim_scale, compute_dtype=jnp.bfloat16)
    out_bf16 = jax.block_until_ready(final_patch_expand2d(x, params_bf16))
    assert out_bf16.shape == out_shape, out_bf16.shape
    assert out_bf16.dtype == jnp.bfloat16, out_bf16.dtype
    assert jnp.allclose(out_bf16.astype(jnp.float32), ref, atol=7e-2, rtol=7e-2), \
        float(jnp.max(jnp.abs(out_bf16.astype(jnp.float32) - ref)))

    print("KERNEL_OK")
</pallas_src>

<mosaic_0001>
module attributes {stable_mosaic.version = 11 : i64} {
  func.func @_expand_shuffle_ln_kernel(%arg0: i32, %arg1: memref<128x32xf32, #tpu.memory_space<vmem>>, %arg2: memref<4x32x32xf32, #tpu.memory_space<vmem>>, %arg3: memref<4x32x32xf32, #tpu.memory_space<vmem>>, %arg4: memref<32x32xf32, #tpu.memory_space<vmem>>, %arg5: memref<1x32xf32, #tpu.memory_space<vmem>>, %arg6: memref<1x32xf32, #tpu.memory_space<vmem>>, %arg7: memref<16x4x8x32xf32, #tpu.memory_space<vmem>>) attributes {dimension_semantics = [#tpu.dimension_semantics<parallel>], iteration_bounds = array<i64: 1>, scalar_prefetch = 0 : i64, scratch_operands = 0 : i64, tpu.core_type = #tpu.core_type<tc>, window_params = [{transform_indices = @transform_0, window_bounds = array<i64: 128, 32>}, {pipeline_mode = #tpu.pipeline_mode<synchronous>, transform_indices = @transform_1, window_bounds = array<i64: 4, 32, 32>}, {pipeline_mode = #tpu.pipeline_mode<synchronous>, transform_indices = @transform_2, window_bounds = array<i64: 4, 32, 32>}, {pipeline_mode = #tpu.pipeline_mode<synchronous>, transform_indices = @transform_3, window_bounds = array<i64: 32, 32>}, {pipeline_mode = #tpu.pipeline_mode<synchronous>, transform_indices = @transform_4, window_bounds = array<i64: 1, 32>}, {pipeline_mode = #tpu.pipeline_mode<synchronous>, transform_indices = @transform_5, window_bounds = array<i64: 1, 32>}, {transform_indices = @transform_6, window_bounds = array<i64: 16, 4, 8, 32>}]} {
    %c0 = arith.constant 0 : index
    %c0_0 = arith.constant 0 : index
    %0 = vector.load %arg1[%c0, %c0_0] : memref<128x32xf32, #tpu.memory_space<vmem>>, vector<128x32xf32>
    %c0_1 = arith.constant 0 : index
    %c0_2 = arith.constant 0 : index
    %1 = vector.load %arg4[%c0_1, %c0_2] : memref<32x32xf32, #tpu.memory_space<vmem>>, vector<32x32xf32>
    %c0_3 = arith.constant 0 : index
    %c0_4 = arith.constant 0 : index
    %2 = vector.load %arg5[%c0_3, %c0_4] : memref<1x32xf32, #tpu.memory_space<vmem>>, vector<1x32xf32>
    %c0_5 = arith.constant 0 : index
    %c0_6 = arith.constant 0 : index
    %3 = vector.load %arg6[%c0_5, %c0_6] : memref<1x32xf32, #tpu.memory_space<vmem>>, vector<1x32xf32>
    %c0_7 = arith.constant 0 : index
    %c0_8 = arith.constant 0 : index
    %c0_9 = arith.constant 0 : index
    %4 = vector.load %arg2[%c0_7, %c0_8, %c0_9] : memref<4x32x32xf32, #tpu.memory_space<vmem>>, vector<1x32x32xf32>
    %5 = vector.shape_cast %4 : vector<1x32x32xf32> to vector<32x32xf32>
    %cst = arith.constant dense<0.000000e+00> : vector<128x32xf32>
    %6 = tpu.matmul %0, %5, %cst {dimension_numbers = #tpu.dot_dimension_numbers<[1], [0], [0], [1], [0, 0, 1, 1], [], []>} : vector<128x32xf32>, vector<32x32xf32>, vector<128x32xf32> -> vector<128x32xf32>
    %c0_10 = arith.constant 0 : index
    %c0_11 = arith.constant 0 : index
    %c0_12 = arith.constant 0 : index
    %7 = vector.load %arg3[%c0_10, %c0_11, %c0_12] : memref<4x32x32xf32, #tpu.memory_space<vmem>>, vector<1x32x32xf32>
    %8 = vector.shape_cast %7 : vector<1x32x32xf32> to vector<32x32xf32>
    %cst_13 = arith.constant dense<0.000000e+00> : vector<128x32xf32>
    %9 = tpu.matmul %0, %8, %cst_13 {dimension_numbers = #tpu.dot_dimension_numbers<[1], [0], [0], [1], [0, 0, 1, 1], [], []>} : vector<128x32xf32>, vector<32x32xf32>, vector<128x32xf32> -> vector<128x32xf32>
    %10 = arith.subf %6, %9 : vector<128x32xf32>
    %11 = arith.mulf %10, %10 : vector<128x32xf32>
    %cst_14 = arith.constant dense<0.000000e+00> : vector<128x32xf32>
    %12 = tpu.matmul %11, %1, %cst_14 {dimension_numbers = #tpu.dot_dimension_numbers<[1], [0], [0], [1], [0, 0, 1, 1], [], []>} : vector<128x32xf32>, vector<32x32xf32>, vector<128x32xf32> -> vector<128x32xf32>
    %cst_15 = arith.constant 1.250000e-01 : f32
    %13 = vector.broadcast %cst_15 : f32 to vector<128x32xf32>
    %14 = arith.mulf %12, %13 : vector<128x32xf32>
    %cst_16 = arith.constant 9.99999974E-6 : f32
    %15 = vector.broadcast %cst_16 : f32 to vector<128x32xf32>
    %16 = arith.addf %14, %15 : vector<128x32xf32>
    %17 = math.rsqrt %16 : vector<128x32xf32>
    %18 = arith.mulf %10, %17 : vector<128x32xf32>
    %19 = vector.broadcast %2 : vector<1x32xf32> to vector<128x32xf32>
    %20 = arith.mulf %18, %19 : vector<128x32xf32>
    %21 = vector.broadcast %3 : vector<1x32xf32> to vector<128x32xf32>
    %22 = arith.addf %20, %21 : vector<128x32xf32>
    %23 = vector.shape_cast %22 : vector<128x32xf32> to vector<16x8x32xf32>
    %c0_17 = arith.constant 0 : index
    %c0_18 = arith.constant 0 : index
    %c0_19 = arith.constant 0 : index
    %c0_20 = arith.constant 0 : index
    %24 = vector.load %arg7[%c0_17, %c0_18, %c0_19, %c0_20] : memref<16x4x8x32xf32, #tpu.memory_space<vmem>>, vector<16x1x8x32xf32>
    %25 = vector.shape_cast %24 : vector<16x1x8x32xf32> to vector<16x8x32xf32>
    %26 = vector.shape_cast %23 : vector<16x8x32xf32> to vector<16x1x8x32xf32>
    tpu.vector_store %arg7[%c0_17, %c0_18, %c0_19, %c0_20], %26 {strides = array<i32>} : memref<16x4x8x32xf32, #tpu.memory_space<vmem>>, vector<16x1x8x32xf32>,
    %c1 = arith.constant 1 : index
    %c0_21 = arith.constant 0 : index
    %c0_22 = arith.constant 0 : index
    %27 = vector.load %arg2[%c1, %c0_21, %c0_22] : memref<4x32x32xf32, #tpu.memory_space<vmem>>, vector<1x32x32xf32>
    %28 = vector.shape_cast %27 : vector<1x32x32xf32> to vector<32x32xf32>
    %cst_23 = arith.constant dense<0.000000e+00> : vector<128x32xf32>
    %29 = tpu.matmul %0, %28, %cst_23 {dimension_numbers = #tpu.dot_dimension_numbers<[1], [0], [0], [1], [0, 0, 1, 1], [], []>} : vector<128x32xf32>, vector<32x32xf32>, vector<128x32xf32> -> vector<128x32xf32>
    %c1_24 = arith.constant 1 : index
    %c0_25 = arith.constant 0 : index
    %c0_26 = arith.constant 0 : index
    %30 = vector.load %arg3[%c1_24, %c0_25, %c0_26] : memref<4x32x32xf32, #tpu.memory_space<vmem>>, vector<1x32x32xf32>
    %31 = vector.shape_cast %30 : vector<1x32x32xf32> to vector<32x32xf32>
    %cst_27 = arith.constant dense<0.000000e+00> : vector<128x32xf32>
    %32 = tpu.matmul %0, %31, %cst_27 {dimension_numbers = #tpu.dot_dimension_numbers<[1], [0], [0], [1], [0, 0, 1, 1], [], []>} : vector<128x32xf32>, vector<32x32xf32>, vector<128x32xf32> -> vector<128x32xf32>
    %33 = arith.subf %29, %32 : vector<128x32xf32>
    %34 = arith.mulf %33, %33 : vector<128x32xf32>
    %cst_28 = arith.constant dense<0.000000e+00> : vector<128x32xf32>
    %35 = tpu.matmul %34, %1, %cst_28 {dimension_numbers = #tpu.dot_dimension_numbers<[1], [0], [0], [1], [0, 0, 1, 1], [], []>} : vector<128x32xf32>, vector<32x32xf32>, vector<128x32xf32> -> vector<128x32xf32>
    %cst_29 = arith.constant 1.250000e-01 : f32
    %36 = vector.broadcast %cst_29 : f32 to vector<128x32xf32>
    %37 = arith.mulf %35, %36 : vector<128x32xf32>
    %cst_30 = arith.constant 9.99999974E-6 : f32
    %38 = vector.broadcast %cst_30 : f32 to vector<128x32xf32>
    %39 = arith.addf %37, %38 : vector<128x32xf32>
    %40 = math.rsqrt %39 : vector<128x32xf32>
    %41 = arith.mulf %33, %40 : vector<128x32xf32>
    %42 = vector.broadcast %2 : vector<1x32xf32> to vector<128x32xf32>
    %43 = arith.mulf %41, %42 : vector<128x32xf32>
    %44 = vector.broadcast %3 : vector<1x32xf32> to vector<128x32xf32>
    %45 = arith.addf %43, %44 : vector<128x32xf32>
    %46 = vector.shape_cast %45 : vector<128x32xf32> to vector<16x8x32xf32>
    %c0_31 = arith.constant 0 : index
    %c1_32 = arith.constant 1 : index
    %c0_33 = arith.constant 0 : index
    %c0_34 = arith.constant 0 : index
    %47 = vector.load %arg7[%c0_31, %c1_32, %c0_33, %c0_34] : memref<16x4x8x32xf32, #tpu.memory_space<vmem>>, vector<16x1x8x32xf32>
    %48 = vector.shape_cast %47 : vector<16x1x8x32xf32> to vector<16x8x32xf32>
    %49 = vector.shape_cast %46 : vector<16x8x32xf32> to vector<16x1x8x32xf32>
    tpu.vector_store %arg7[%c0_31, %c1_32, %c0_33, %c0_34], %49 {strides = array<i32>} : memref<16x4x8x32xf32, #tpu.memory_space<vmem>>, vector<16x1x8x32xf32>,
    %c2 = arith.constant 2 : index
    %c0_35 = arith.constant 0 : index
    %c0_36 = arith.constant 0 : index
    %50 = vector.load %arg2[%c2, %c0_35, %c0_36] : memref<4x32x32xf32, #tpu.memory_space<vmem>>, vector<1x32x32xf32>
    %51 = vector.shape_cast %50 : vector<1x32x32xf32> to vector<32x32xf32>
    %cst_37 = arith.constant dense<0.000000e+00> : vector<128x32xf32>
    %52 = tpu.matmul %0, %51, %cst_37 {dimension_numbers = #tpu.dot_dimension_numbers<[1], [0], [0], [1], [0, 0, 1, 1], [], []>} : vector<128x32xf32>, vector<32x32xf32>, vector<128x32xf32> -> vector<128x32xf32>
    %c2_38 = arith.constant 2 : index
    %c0_39 = arith.constant 0 : index
    %c0_40 = arith.constant 0 : index
    %53 = vector.load %arg3[%c2_38, %c0_39, %c0_40] : memref<4x32x32xf32, #tpu.memory_space<vmem>>, vector<1x32x32xf32>
    %54 = vector.shape_cast %53 : vector<1x32x32xf32> to vector<32x32xf32>
    %cst_41 = arith.constant dense<0.000000e+00> : vector<128x32xf32>
    %55 = tpu.matmul %0, %54, %cst_41 {dimension_numbers = #tpu.dot_dimension_numbers<[1], [0], [0], [1], [0, 0, 1, 1], [], []>} : vector<128x32xf32>, vector<32x32xf32>, vector<128x32xf32> -> vector<128x32xf32>
    %56 = arith.subf %52, %55 : vector<128x32xf32>
    %57 = arith.mulf %56, %56 : vector<128x32xf32>
    %cst_42 = arith.constant dense<0.000000e+00> : vector<128x32xf32>
    %58 = tpu.matmul %57, %1, %cst_42 {dimension_numbers = #tpu.dot_dimension_numbers<[1], [0], [0], [1], [0, 0, 1, 1], [], []>} : vector<128x32xf32>, vector<32x32xf32>, vector<128x32xf32> -> vector<128x32xf32>
    %cst_43 = arith.constant 1.250000e-01 : f32
    %59 = vector.broadcast %cst_43 : f32 to vector<128x32xf32>
    %60 = arith.mulf %58, %59 : vector<128x32xf32>
    %cst_44 = arith.constant 9.99999974E-6 : f32
    %61 = vector.broadcast %cst_44 : f32 to vector<128x32xf32>
    %62 = arith.addf %60, %61 : vector<128x32xf32>
    %63 = math.rsqrt %62 : vector<128x32xf32>
    %64 = arith.mulf %56, %63 : vector<128x32xf32>
    %65 = vector.broadcast %2 : vector<1x32xf32> to vector<128x32xf32>
    %66 = arith.mulf %64, %65 : vector<128x32xf32>
    %67 = vector.broadcast %3 : vector<1x32xf32> to vector<128x32xf32>
    %68 = arith.addf %66, %67 : vector<128x32xf32>
    %69 = vector.shape_cast %68 : vector<128x32xf32> to vector<16x8x32xf32>
    %c0_45 = arith.constant 0 : index
    %c2_46 = arith.constant 2 : index
    %c0_47 = arith.constant 0 : index
    %c0_48 = arith.constant 0 : index
    %70 = vector.load %arg7[%c0_45, %c2_46, %c0_47, %c0_48] : memref<16x4x8x32xf32, #tpu.memory_space<vmem>>, vector<16x1x8x32xf32>
    %71 = vector.shape_cast %70 : vector<16x1x8x32xf32> to vector<16x8x32xf32>
    %72 = vector.shape_cast %69 : vector<16x8x32xf32> to vector<16x1x8x32xf32>
    tpu.vector_store %arg7[%c0_45, %c2_46, %c0_47, %c0_48], %72 {strides = array<i32>} : memref<16x4x8x32xf32, #tpu.memory_space<vmem>>, vector<16x1x8x32xf32>,
    %c3 = arith.constant 3 : index
    %c0_49 = arith.constant 0 : index
    %c0_50 = arith.constant 0 : index
    %73 = vector.load %arg2[%c3, %c0_49, %c0_50] : memref<4x32x32xf32, #tpu.memory_space<vmem>>, vector<1x32x32xf32>
    %74 = vector.shape_cast %73 : vector<1x32x32xf32> to vector<32x32xf32>
    %cst_51 = arith.constant dense<0.000000e+00> : vector<128x32xf32>
    %75 = tpu.matmul %0, %74, %cst_51 {dimension_numbers = #tpu.dot_dimension_numbers<[1], [0], [0], [1], [0, 0, 1, 1], [], []>} : vector<128x32xf32>, vector<32x32xf32>, vector<128x32xf32> -> vector<128x32xf32>
    %c3_52 = arith.constant 3 : index
    %c0_53 = arith.constant 0 : index
    %c0_54 = arith.constant 0 : index
    %76 = vector.load %arg3[%c3_52, %c0_53, %c0_54] : memref<4x32x32xf32, #tpu.memory_space<vmem>>, vector<1x32x32xf32>
    %77 = vector.shape_cast %76 : vector<1x32x32xf32> to vector<32x32xf32>
    %cst_55 = arith.constant dense<0.000000e+00> : vector<128x32xf32>
    %78 = tpu.matmul %0, %77, %cst_55 {dimension_numbers = #tpu.dot_dimension_numbers<[1], [0], [0], [1], [0, 0, 1, 1], [], []>} : vector<128x32xf32>, vector<32x32xf32>, vector<128x32xf32> -> vector<128x32xf32>
    %79 = arith.subf %75, %78 : vector<128x32xf32>
    %80 = arith.mulf %79, %79 : vector<128x32xf32>
    %cst_56 = arith.constant dense<0.000000e+00> : vector<128x32xf32>
    %81 = tpu.matmul %80, %1, %cst_56 {dimension_numbers = #tpu.dot_dimension_numbers<[1], [0], [0], [1], [0, 0, 1, 1], [], []>} : vector<128x32xf32>, vector<32x32xf32>, vector<128x32xf32> -> vector<128x32xf32>
    %cst_57 = arith.constant 1.250000e-01 : f32
    %82 = vector.broadcast %cst_57 : f32 to vector<128x32xf32>
    %83 = arith.mulf %81, %82 : vector<128x32xf32>
    %cst_58 = arith.constant 9.99999974E-6 : f32
    %84 = vector.broadcast %cst_58 : f32 to vector<128x32xf32>
    %85 = arith.addf %83, %84 : vector<128x32xf32>
    %86 = math.rsqrt %85 : vector<128x32xf32>
    %87 = arith.mulf %79, %86 : vector<128x32xf32>
    %88 = vector.broadcast %2 : vector<1x32xf32> to vector<128x32xf32>
    %89 = arith.mulf %87, %88 : vector<128x32xf32>
    %90 = vector.broadcast %3 : vector<1x32xf32> to vector<128x32xf32>
    %91 = arith.addf %89, %90 : vector<128x32xf32>
    %92 = vector.shape_cast %91 : vector<128x32xf32> to vector<16x8x32xf32>
    %c0_59 = arith.constant 0 : index
    %c3_60 = arith.constant 3 : index
    %c0_61 = arith.constant 0 : index
    %c0_62 = arith.constant 0 : index
    %93 = vector.load %arg7[%c0_59, %c3_60, %c0_61, %c0_62] : memref<16x4x8x32xf32, #tpu.memory_space<vmem>>, vector<16x1x8x32xf32>
    %94 = vector.shape_cast %93 : vector<16x1x8x32xf32> to vector<16x8x32xf32>
    %95 = vector.shape_cast %92 : vector<16x8x32xf32> to vector<16x1x8x32xf32>
    tpu.vector_store %arg7[%c0_59, %c3_60, %c0_61, %c0_62], %95 {strides = array<i32>} : memref<16x4x8x32xf32, #tpu.memory_space<vmem>>, vector<16x1x8x32xf32>,
    return
  }
  func.func @transform_0(%arg0: i32) -> (i32, i32) {
    %c0_i32 = arith.constant 0 : i32
    %c0_i32_0 = arith.constant 0 : i32
    return %arg0, %c0_i32 : i32, i32
  }
  func.func @transform_1(%arg0: i32) -> (i32, i32, i32) {
    %c0_i32 = arith.constant 0 : i32
    %c0_i32_0 = arith.constant 0 : i32
    %c0_i32_1 = arith.constant 0 : i32
    %c0_i32_2 = arith.constant 0 : i32
    return %c0_i32, %c0_i32_0, %c0_i32_1 : i32, i32, i32
  }
  func.func @transform_2(%arg0: i32) -> (i32, i32, i32) {
    %c0_i32 = arith.constant 0 : i32
    %c0_i32_0 = arith.constant 0 : i32
    %c0_i32_1 = arith.constant 0 : i32
    %c0_i32_2 = arith.constant 0 : i32
    return %c0_i32, %c0_i32_0, %c0_i32_1 : i32, i32, i32
  }
  func.func @transform_3(%arg0: i32) -> (i32, i32) {
    %c0_i32 = arith.constant 0 : i32
    %c0_i32_0 = arith.constant 0 : i32
    %c0_i32_1 = arith.constant 0 : i32
    return %c0_i32, %c0_i32_0 : i32, i32
  }
  func.func @transform_4(%arg0: i32) -> (i32, i32) {
    %c0_i32 = arith.constant 0 : i32
    %c0_i32_0 = arith.constant 0 : i32
    %c0_i32_1 = arith.constant 0 : i32
    return %c0_i32, %c0_i32_0 : i32, i32
  }
  func.func @transform_5(%arg0: i32) -> (i32, i32) {
    %c0_i32 = arith.constant 0 : i32
    %c0_i32_0 = arith.constant 0 : i32
    %c0_i32_1 = arith.constant 0 : i32
    return %c0_i32, %c0_i32_0 : i32, i32
  }
  func.func @transform_6(%arg0: i32) -> (i32, i32, i32, i32) {
    %c0_i32 = arith.constant 0 : i32
    %c0_i32_0 = arith.constant 0 : i32
    %c0_i32_1 = arith.constant 0 : i32
    %c0_i32_2 = arith.constant 0 : i32
    return %arg0, %c0_i32, %c0_i32_0, %c0_i32_1 : i32, i32, i32, i32
  }
}

</mosaic_0001>

<bundles_post_ra>
// kernel: tpu_custom_call.1
= control target key start
LH: loop header
LB: loop body
LE: loop exit
PB: predicated region body
PF: predicated region fallthrough
CT: control target
= control target key end

     0   :  { %11 = vsyncpa [#allocation3], 0  ;;  %s5076_s0 = inlined_call_operand.vmem [shape: f32[128,32], index: 0, kind: input, shape index: {}]   ;;  %s5077_s1 = inlined_call_operand.vmem [shape: f32[4,32,32], index: 1, kind: input, shape index: {}]   ;;  %s5078_s2 = inlined_call_operand.hbm [shape: f32[4,32,32], index: 2, kind: input, shape index: {}]   ;;  %s5079_s3 = inlined_call_operand.vmem [shape: f32[32,32], index: 3, kind: input, shape index: {}]   ;;  %s5080_s4 = inlined_call_operand.vmem [shape: f32[1,32], index: 4, kind: input, shape index: {}]   ;;  %s5081_s5 = inlined_call_operand.vmem [shape: f32[1,32], index: 5, kind: input, shape index: {}]   ;;  %s5082_s6 = inlined_call_operand.hbm [shape: f32[16,4,8,32], index: 6, kind: output, shape index: {}]  }
   0x1   :  { %12 = vsyncpa [#allocation4], 0  ;;  %s3811_s21 = smov [#allocation2]   ;;  %s3763_s25 = scalar_lea.hbm %s5078_s2, 2048 }
   0x2   :  { %s22_s22 = sshll.u32 %s3811_s21, 4  ;;  %p3764_p0 = scmp.ne.s32.totalorder %s5078_s2, %s3763_s25  ;;  %s23_s22 = int_to_ptr.vmem [resolvable:$true] %s22_s22 }
   0x3   :  { %p3767_p1 = scmp.lt.u32.totalorder %s3763_s25, %s5078_s2 }
   0x5   :  { %p3769_p2 = pnand %p3767_p1, %p3764_p0 }
   0x7   :  { %3772 = shalt.err (!%p3769_p2)
}
   0x8   :  { %s3773_s30 = scalar_lea.vmem %s23_s22, 2048  ;;  %p3778_p4 = scmp.lt.s32.totalorder %s23_s22, %s23_s22 }
   0x9   :  { %p3774_p3 = scmp.ne.s32.totalorder %s23_s22, %s3773_s30  ;;  %p3779_p5 = scmp.lt.s32.totalorder %s3773_s30, %s3773_s30 }
   0xb   :  { %p3780_p6 = por %p3779_p5, %p3778_p4 }
   0xd   :  { %p3781_p7 = pnand %p3780_p6, %p3774_p3 }
   0xf   :  { %3784 = shalt.err (!%p3781_p7)
}
  0x10   :  { %s3812_s7 = smov 128   ;;  %s3813_s8 = smov 8  }
  0x11   :  { %28 = dma.hbm_to_vmem [thread:$0]  %s5078_s2, 2048, %s23_s22, [#allocation3], %s3812_s7, %s3812_s7, %s3813_s8  }
  0x12   :  { %3807 = dma.done.wait [#allocation3], 2048  }
  0x13   :  { %3808 = vsyncadd [#allocation3], 4294965248  ;;  %v60_v0 = vld [vmem:[%s5077_s1] sm:$0xff]  ;;  %v61_v1 = vld [vmem:[%s5077_s1 + $0x8] sm:$0xff]  ;;  %vm64_vm0 = vcmask 261120  }
  0x14   :  { %v258_v2 = vld [vmem:[#allocation2] sm:$0xff]  ;;  %v3517_v3 = vpack.c.bf16 %v61_v1, %v60_v0  ;;  %v259_v4 = vld [vmem:[#allocation2 + $0x8] sm:$0xff]  ;;  %v62_v5 = vld [vmem:[%s5077_s1 + $0x10] sm:$0xff] }
  0x15   :  { %v63_v6 = vld [vmem:[%s5077_s1 + $0x18] sm:$0xff]  ;;  %v3525_v7 = vpack.c.bf16 %v259_v4, %v258_v2  ;;  %v260_v9 = vld [vmem:[#allocation2 + $0x10] sm:$0xff]  ;;  %v3880_v11 = vld [vmem:[%s5076_s0] sm:$0xff] }
  0x16   :  { %v3521_v8 = vpack.c.bf16 %v63_v6, %v62_v5  ;;  %v261_v10 = vld [vmem:[#allocation2 + $0x18] sm:$0xff]  ;;  %3518 = vmatprep.subr.bf16.mxu0 %v3517_v3  ;;  %3141 = vmatprep.mubr.msk.f32.mxu0 %vm64_vm0, %v3880_v11  ;;  %v3889_v13 = vld [vmem:[%s5076_s0 + $0x8] sm:$0xff]  ;;  %v54_v14 = vld [vmem:[%s5079_s3] sm:$0xff] }
  0x17   :  { %v3529_v12 = vpack.c.bf16 %v261_v10, %v260_v9  ;;  %3526 = vmatprep.subr.bf16.mxu1 %v3525_v7  ;;  %3520 = vmatpush3.bf16.msra.mxu0 %v3517_v3  ;;  %v55_v15 = vld [vmem:[%s5079_s3 + $0x8] sm:$0xff]  ;;  %v56_v16 = vld [vmem:[%s5079_s3 + $0x10] sm:$0xff]  ;;  %v57_v19 = vld [vmem:[%s5079_s3 + $0x18] sm:$0xff] }
  0x18   :  { %3528 = vmatpush3.bf16.msra.mxu1 %v3525_v7  ;;  %3522 = vmatprep.subr.bf16.mxu0 %v3521_v8  ;;  %v3903_v17 = vld [vmem:[%s5076_s0 + $0x10] sm:$0xff]  ;;  %v3905_v18 = vpack.c.bf16 %v55_v15, %v54_v14  ;;  %v3910_v20 = vpack.c.bf16 %v57_v19, %v56_v16  ;;  %v3922_v21 = vld [vmem:[%s5076_s0 + $0x18] sm:$0xff]  ;;  %v3929_v22 = vld [vmem:[%s5076_s0 + $0x20] sm:$0xff] }
  0x19   :  { %3530 = vmatprep.subr.bf16.mxu1 %v3529_v12  ;;  %3173 = vmatprep.mubr.msk.f32.mxu1 %vm64_vm0, %v3880_v11  ;;  %v3942_v23 = vld [vmem:[%s5076_s0 + $0x28] sm:$0xff]  ;;  %v3949_v24 = vld [vmem:[%s5076_s0 + $0x30] sm:$0xff]  ;;  %v3961_v25 = vld [vmem:[%s5076_s0 + $0x38] sm:$0xff] }
  0x1a   :  { %5095 = vst [vmem:[#allocation8_spill] sm:$0xff] %v3905_v18  ;;  %5096 = vst [vmem:[#allocation9_spill] sm:$0xff] %v3910_v20  ;;  %v3968_v26 = vld [vmem:[%s5076_s0 + $0x40] sm:$0xff]  ;;  %v3979_v27 = vld [vmem:[%s5076_s0 + $0x48] sm:$0xff] }
  0x1b   :  { %3524 = vmatpush3.bf16.msra.mxu0 %v3521_v8  ;;  %v3986_v28 = vld [vmem:[%s5076_s0 + $0x50] sm:$0xff]  ;;  %v3997_v29 = vld [vmem:[%s5076_s0 + $0x58] sm:$0xff]  ;;  %v4004_v30 = vld [vmem:[%s5076_s0 + $0x60] sm:$0xff] }
  0x1c   :  { %3532 = vmatpush3.bf16.msra.mxu1 %v3529_v12  ;;  %3534 = vmatprep.subr.bf16.mxu0 %v3905_v18  ;;  %5097 = vst [vmem:[#allocation10_spill] sm:$0xff] %v4004_v30  ;;  %v4015_v31 = vld [vmem:[%s5076_s0 + $0x68] sm:$0xff]  ;;  %v4022_v32 = vld [vmem:[%s5076_s0 + $0x70] sm:$0xff]  ;;  %v4033_v33 = vld [vmem:[%s5076_s0 + $0x78] sm:$0xff] }
  0x1d   :  { %5098 = vst [vmem:[#allocation11_spill] sm:$0xff] %v4015_v31  ;;  %5099 = vst [vmem:[#allocation12_spill] sm:$0xff] %v4022_v32  ;;  %v2737_v34 = vld [vmem:[%s5077_s1 + $0x20] sm:$0xff]  ;;  %v2738_v35 = vld [vmem:[%s5077_s1 + $0x28] sm:$0xff] }
  0x1e   :  { %3142 = vmatmul.mubr.msk.f32.vlgmr.msra.gmra.mrb[0].mxu0 %vm64_vm0, %v3889_v13  ;;  %5100 = vst [vmem:[#allocation13_spill] sm:$0xff] %v4033_v33  ;;  %v907_v36 = vld [vmem:[#allocation2 + $0x20] sm:$0xff]  ;;  %v3541_v37 = vpack.c.bf16 %v2738_v35, %v2737_v34  ;;  %v908_v38 = vld [vmem:[#allocation2 + $0x28] sm:$0xff]  ;;  %v2739_v40 = vld [vmem:[%s5077_s1 + $0x30] sm:$0xff] }
  0x1f   :  { %3174 = vmatmul.mubr.msk.f32.vlgmr.msra.gmra.mrb[0].mxu1 %vm64_vm0, %v3889_v13  ;;  %3144 = vmatprep.mubr.msk.f32.mxu0 %vm64_vm0, %v3903_v17  ;;  %v3549_v39 = vpack.c.bf16 %v908_v38, %v907_v36  ;;  %v2740_v41 = vld [vmem:[%s5077_s1 + $0x38] sm:$0xff]  ;;  %v909_v49 = vld [vmem:[#allocation2 + $0x30] sm:$0xff] }
  0x20   :  { %3176 = vmatprep.mubr.msk.f32.mxu1 %vm64_vm0, %v3903_v17  ;;  %3536 = vmatpush3.bf16.msra.mxu0 %v3905_v18  ;;  %v3545_v42 = vpack.c.bf16 %v2740_v41, %v2739_v40  ;;  %v910_v50 = vld [vmem:[#allocation2 + $0x38] sm:$0xff] }
  0x21   :  { %3538 = vmatprep.subr.bf16.mxu0 %v3910_v20  ;;  %3542 = vmatprep.subr.bf16.mxu1 %v3541_v37  ;;  %v3553_v58 = vpack.c.bf16 %v910_v50, %v909_v49 }
  0x22   :  { %3145 = vmatmul.mubr.msk.f32.gmra.mrb[2].mxu0 %vm64_vm0, %v3922_v21  ;;  %3544 = vmatpush3.bf16.msra.mxu1 %v3541_v37 }
  0x23   :  { %3177 = vmatmul.mubr.msk.f32.gmra.mrb[2].mxu1 %vm64_vm0, %v3922_v21  ;;  %3147 = vmatprep.mubr.msk.f32.mxu0 %vm64_vm0, %v3929_v22 }
  0x24   :  { %3179 = vmatprep.mubr.msk.f32.mxu1 %vm64_vm0, %v3929_v22  ;;  %3540 = vmatpush3.bf16.msra.mxu0 %v3910_v20 }
  0x25   :  { %3550 = vmatprep.subr.bf16.mxu0 %v3549_v39  ;;  %3546 = vmatprep.subr.bf16.mxu1 %v3545_v42 }
  0x26   :  { %3148 = vmatmul.mubr.msk.f32.gmra.mrb[4].mxu0 %vm64_vm0, %v3942_v23  ;;  %3548 = vmatpush3.bf16.msra.mxu1 %v3545_v42 }
  0x27   :  { %3180 = vmatmul.mubr.msk.f32.gmra.mrb[4].mxu1 %vm64_vm0, %v3942_v23  ;;  %3150 = vmatprep.mubr.msk.f32.mxu0 %vm64_vm0, %v3949_v24 }
  0x28   :  { %3182 = vmatprep.mubr.msk.f32.mxu1 %vm64_vm0, %v3949_v24  ;;  %3558 = vmatprep.subr.bf16.mxu1 %v3905_v18 }
  0x2a   :  { %3151 = vmatmul.mubr.msk.f32.gmra.mrb[6].mxu0 %vm64_vm0, %v3961_v25 }
  0x2b   :  { %3183 = vmatmul.mubr.msk.f32.gmra.mrb[6].mxu1 %vm64_vm0, %v3961_v25  ;;  %3153 = vmatprep.mubr.msk.f32.mxu0 %vm64_vm0, %v3968_v26 }
  0x2c   :  { %3185 = vmatprep.mubr.msk.f32.mxu1 %vm64_vm0, %v3968_v26 }
  0x2e   :  { %3154 = vmatmul.mubr.msk.f32.gmra.mrb[8].mxu0 %vm64_vm0, %v3979_v27 }
  0x2f   :  { %3186 = vmatmul.mubr.msk.f32.gmra.mrb[8].mxu1 %vm64_vm0, %v3979_v27  ;;  %3156 = vmatprep.mubr.msk.f32.mxu0 %vm64_vm0, %v3986_v28 }
  0x30   :  { %3188 = vmatprep.mubr.msk.f32.mxu1 %vm64_vm0, %v3986_v28 }
  0x32   :  { %3157 = vmatmul.mubr.msk.f32.gmra.mrb[10].mxu0 %vm64_vm0, %v3997_v29 }
  0x33   :  { %3189 = vmatmul.mubr.msk.f32.gmra.mrb[10].mxu1 %vm64_vm0, %v3997_v29  ;;  %3159 = vmatprep.mubr.msk.f32.mxu0 %vm64_vm0, %v4004_v30 }
  0x34   :  { %3191 = vmatprep.mubr.msk.f32.mxu1 %vm64_vm0, %v4004_v30 }
  0x36   :  { %3160 = vmatmul.mubr.msk.f32.gmra.mrb[12].mxu0 %vm64_vm0, %v4015_v31 }
  0x37   :  { %3192 = vmatmul.mubr.msk.f32.gmra.mrb[12].mxu1 %vm64_vm0, %v4015_v31  ;;  %3162 = vmatprep.mubr.msk.f32.mxu0 %vm64_vm0, %v4022_v32 }
  0x38   :  { %3194 = vmatprep.mubr.msk.f32.mxu1 %vm64_vm0, %v4022_v32 }
  0x3a   :  { %3163 = vmatmul.mubr.msk.f32.gmra.mrb[14].mxu0 %vm64_vm0, %v4033_v33 }
  0x3b   :  { %3195 = vmatmul.mubr.msk.f32.gmra.mrb[14].mxu1 %vm64_vm0, %v4033_v33 }
  0x3c   :  { %3237 = vmatprep.mubr.msk.f32.mxu1 %vm64_vm0, %v3880_v11 }
  0x3f   :  { %3238 = vmatmul.mubr.msk.f32.vlgmr.msra.gmra.mrb[16].mxu1 %vm64_vm0, %v3889_v13 }
  0x40   :  { %3240 = vmatprep.mubr.msk.f32.mxu1 %vm64_vm0, %v3903_v17  ;;  %3560 = vmatpush3.bf16.msra.mxu1 %v3905_v18 }
  0x41   :  { %3562 = vmatprep.subr.bf16.mxu1 %v3910_v20 }
  0x43   :  { %3241 = vmatmul.mubr.msk.f32.gmra.mrb[18].mxu1 %vm64_vm0, %v3922_v21 }
  0x44   :  { %3243 = vmatprep.mubr.msk.f32.mxu1 %vm64_vm0, %v3929_v22  ;;  %3564 = vmatpush3.bf16.msra.mxu1 %v3910_v20 }
  0x47   :  { %3244 = vmatmul.mubr.msk.f32.gmra.mrb[20].mxu1 %vm64_vm0, %v3942_v23 }
  0x48   :  { %3246 = vmatprep.mubr.msk.f32.mxu1 %vm64_vm0, %v3949_v24 }
  0x4b   :  { %3247 = vmatmul.mubr.msk.f32.gmra.mrb[22].mxu1 %vm64_vm0, %v3961_v25 }
  0x4c   :  { %3249 = vmatprep.mubr.msk.f32.mxu1 %vm64_vm0, %v3968_v26 }
  0x4f   :  { %3250 = vmatmul.mubr.msk.f32.gmra.mrb[24].mxu1 %vm64_vm0, %v3979_v27 }
  0x50   :  { %3252 = vmatprep.mubr.msk.f32.mxu1 %vm64_vm0, %v3986_v28 }
  0x53   :  { %3253 = vmatmul.mubr.msk.f32.gmra.mrb[26].mxu1 %vm64_vm0, %v3997_v29 }
  0x54   :  { %3255 = vmatprep.mubr.msk.f32.mxu1 %vm64_vm0, %v4004_v30 }
  0x57   :  { %3256 = vmatmul.mubr.msk.f32.gmra.mrb[28].mxu1 %vm64_vm0, %v4015_v31 }
  0x58   :  { %3258 = vmatprep.mubr.msk.f32.mxu1 %vm64_vm0, %v4022_v32 }
  0x5b   :  { %3259 = vmatmul.mubr.msk.f32.gmra.mrb[30].mxu1 %vm64_vm0, %v4033_v33 }
  0xf1   :  { %v3143_v43 = vpop.f32.mrb[0].mxu0 }
  0xf2   :  { %v3175_v44 = vpop.f32.mrb[0].mxu1  ;;  %v179_v45 = vpop.f32.mrb[1].mxu0 }
  0xf3   :  { %v4089_v46 = vsub.f32 %v3143_v43, %v3175_v44  ;;  %v328_v47 = vpop.f32.mrb[1].mxu1 }
  0xf4   :  { %v4091_v48 = vsub.f32 %v179_v45, %v328_v47 }
  0xf5   :  { %v3146_v51 = vpop.f32.mrb[2].mxu0  ;;  %v424_v55 = vmul.f32 %v4089_v46, %v4089_v46 }
  0xf6   :  { %v423_v52 = vmul.f32 %v4091_v48, %v4091_v48  ;;  %v3178_v53 = vpop.f32.mrb[2].mxu1  ;;  %v189_v54 = vpop.f32.mrb[3].mxu0 }
  0xf7   :  { %v4097_v56 = vsub.f32 %v3146_v51, %v3178_v53  ;;  %v338_v57 = vpop.f32.mrb[3].mxu1 }
  0xf8   :  { %v4099_v59 = vsub.f32 %v189_v54, %v338_v57  ;;  %3205 = vmatprep.mubr.msk.f32.mxu0 %vm64_vm0, %v423_v52 }
  0xf9   :  { %3206 = vmatmul.mubr.msk.f32.vlgmr.msra.gmra.mrb[16].mxu0 %vm64_vm0, %v424_v55  ;;  %v3149_v60 = vpop.f32.mrb[4].mxu0  ;;  %v426_v0 = vmul.f32 %v4097_v56, %v4097_v56 }
  0xfa   :  { %v425_v61 = vmul.f32 %v4099_v59, %v4099_v59  ;;  %3552 = vmatpush3.bf16.msra.mxu0 %v3549_v39  ;;  %v3181_v62 = vpop.f32.mrb[4].mxu1  ;;  %v199_v63 = vpop.f32.mrb[5].mxu0 }
  0xfb   :  { %v4107_v1 = vsub.f32 %v3149_v60, %v3181_v62  ;;  %v348_v2 = vpop.f32.mrb[5].mxu1  ;;  %3554 = vmatprep.subr.bf16.mxu0 %v3553_v58 }
  0xfc   :  { %v4109_v3 = vsub.f32 %v199_v63, %v348_v2  ;;  %3208 = vmatprep.mubr.msk.f32.mxu0 %vm64_vm0, %v425_v61 }
  0xfd   :  { %3209 = vmatmul.mubr.msk.f32.gmra.mrb[18].mxu0 %vm64_vm0, %v426_v0  ;;  %v3152_v4 = vpop.f32.mrb[6].mxu0  ;;  %v428_v8 = vmul.f32 %v4107_v1, %v4107_v1 }
  0xfe   :  { %v427_v5 = vmul.f32 %v4109_v3, %v4109_v3  ;;  %v3184_v6 = vpop.f32.mrb[6].mxu1  ;;  %v209_v7 = vpop.f32.mrb[7].mxu0  ;;  %3556 = vmatpush3.bf16.msra.mxu0 %v3553_v58 }
  0xff   :  { %v4117_v9 = vsub.f32 %v3152_v4, %v3184_v6  ;;  %v358_v10 = vpop.f32.mrb[7].mxu1 }
 0x100   :  { %v4119_v12 = vsub.f32 %v209_v7, %v358_v10  ;;  %3211 = vmatprep.mubr.msk.f32.mxu0 %vm64_vm0, %v427_v5 }
 0x101   :  { %3212 = vmatmul.mubr.msk.f32.gmra.mrb[20].mxu0 %vm64_vm0, %v428_v8  ;;  %v3155_v14 = vpop.f32.mrb[8].mxu0  ;;  %v430_v34 = vmul.f32 %v4117_v9, %v4117_v9 }
 0x102   :  { %v429_v15 = vmul.f32 %v4119_v12, %v4119_v12  ;;  %v3187_v16 = vpop.f32.mrb[8].mxu1  ;;  %v219_v19 = vpop.f32.mrb[9].mxu0 }
 0x103   :  { %v4127_v35 = vsub.f32 %v3155_v14, %v3187_v16  ;;  %v368_v36 = vpop.f32.mrb[9].mxu1 }
 0x104   :  { %v4129_v37 = vsub.f32 %v219_v19, %v368_v36  ;;  %3214 = vmatprep.mubr.msk.f32.mxu0 %vm64_vm0, %v429_v15 }
 0x105   :  { %3215 = vmatmul.mubr.msk.f32.gmra.mrb[22].mxu0 %vm64_vm0, %v430_v34  ;;  %v3158_v38 = vpop.f32.mrb[10].mxu0  ;;  %v432_v42 = vmul.f32 %v4127_v35, %v4127_v35 }
 0x106   :  { %v431_v39 = vmul.f32 %v4129_v37, %v4129_v37  ;;  %v3190_v40 = vpop.f32.mrb[10].mxu1  ;;  %v229_v41 = vpop.f32.mrb[11].mxu0 }
 0x107   :  { %v4137_v43 = vsub.f32 %v3158_v38, %v3190_v40  ;;  %v378_v44 = vpop.f32.mrb[11].mxu1  ;;  %v2789_v38 = vld [vmem:[%s5077_s1 + $0x40] sm:$0xff] }
 0x108   :  { %v4139_v45 = vsub.f32 %v229_v41, %v378_v44  ;;  %3217 = vmatprep.mubr.msk.f32.mxu0 %vm64_vm0, %v431_v39  ;;  %v2790_v39 = vld [vmem:[%s5077_s1 + $0x48] sm:$0xff]  ;;  %v1545_v40 = vld [vmem:[#allocation2 + $0x40] sm:$0xff] }
 0x109   :  { %3218 = vmatmul.mubr.msk.f32.gmra.mrb[24].mxu0 %vm64_vm0, %v432_v42  ;;  %v3161_v47 = vpop.f32.mrb[12].mxu0  ;;  %v434_v52 = vmul.f32 %v4137_v43, %v4137_v43  ;;  %v3565_v42 = vpack.c.bf16 %v2790_v39, %v2789_v38  ;;  %v1546_v44 = vld [vmem:[#allocation2 + $0x48] sm:$0xff] }
 0x10a   :  { %v433_v49 = vmul.f32 %v4139_v45, %v4139_v45  ;;  %v3193_v50 = vpop.f32.mrb[12].mxu1  ;;  %v239_v51 = vpop.f32.mrb[13].mxu0 }
 0x10b   :  { %v4147_v53 = vsub.f32 %v3161_v47, %v3193_v50  ;;  %v388_v54 = vpop.f32.mrb[13].mxu1  ;;  %3566 = vmatprep.subr.bf16.mxu0 %v3565_v42 }
 0x10c   :  { %v4149_v55 = vsub.f32 %v239_v51, %v388_v54  ;;  %3220 = vmatprep.mubr.msk.f32.mxu0 %vm64_vm0, %v433_v49  ;;  %v4233_v49 = vpack.c.bf16 %v1546_v44, %v1545_v40  ;;  %v2791_v51 = vld [vmem:[%s5077_s1 + $0x50] sm:$0xff] }
 0x10d   :  { %3221 = vmatmul.mubr.msk.f32.gmra.mrb[26].mxu0 %vm64_vm0, %v434_v52  ;;  %v3164_v57 = vpop.f32.mrb[14].mxu0  ;;  %v436_v62 = vmul.f32 %v4147_v53, %v4147_v53  ;;  %v2792_v52 = vld [vmem:[%s5077_s1 + $0x58] sm:$0xff] }
 0x10e   :  { %v435_v58 = vmul.f32 %v4149_v55, %v4149_v55  ;;  %v3196_v60 = vpop.f32.mrb[14].mxu1  ;;  %v249_v61 = vpop.f32.mrb[15].mxu0  ;;  %3574 = vmatprep.subr.bf16.mxu1 %v4233_v49 }
 0x10f   :  { %v4157_v63 = vsub.f32 %v3164_v57, %v3196_v60  ;;  %v398_v0 = vpop.f32.mrb[15].mxu1  ;;  %v3569_v57 = vpack.c.bf16 %v2792_v52, %v2791_v51 }
 0x110   :  { %v4159_v2 = vsub.f32 %v249_v61, %v398_v0  ;;  %3223 = vmatprep.mubr.msk.f32.mxu0 %vm64_vm0, %v435_v58 }
 0x111   :  { %3224 = vmatmul.mubr.msk.f32.gmra.mrb[28].mxu0 %vm64_vm0, %v436_v62  ;;  %v438_v5 = vmul.f32 %v4157_v63, %v4157_v63 }
 0x112   :  { %v437_v4 = vmul.f32 %v4159_v2, %v4159_v2  ;;  %v4203_v6 = vpop.f32.mrb[16].mxu1 }
 0x113   :  { %v4205_v7 = vpop.f32.mrb[17].mxu1 }
 0x114   :  { %3226 = vmatprep.mubr.msk.f32.mxu0 %vm64_vm0, %v437_v4 }
 0x115   :  { %3227 = vmatmul.mubr.msk.f32.gmra.mrb[30].mxu0 %vm64_vm0, %v438_v5 }
 0x116   :  { %3269 = vmatprep.mubr.msk.f32.mxu0 %vm64_vm0, %v3880_v11  ;;  %v4207_v8 = vpop.f32.mrb[18].mxu1 }
 0x117   :  { %v4209_v10 = vpop.f32.mrb[19].mxu1 }
 0x119   :  { %3270 = vmatmul.mubr.msk.f32.vlgmr.msra.gmra.mrb[32].mxu0 %vm64_vm0, %v3889_v13 }
 0x11a   :  { %3272 = vmatprep.mubr.msk.f32.mxu0 %vm64_vm0, %v3903_v17  ;;  %v4211_v14 = vpop.f32.mrb[20].mxu1  ;;  %3568 = vmatpush3.bf16.msra.mxu0 %v3565_v42 }
 0x11b   :  { %v4213_v15 = vpop.f32.mrb[21].mxu1  ;;  %3570 = vmatprep.subr.bf16.mxu0 %v3569_v57 }
 0x11d   :  { %3273 = vmatmul.mubr.msk.f32.gmra.mrb[34].mxu0 %vm64_vm0, %v3922_v21 }
 0x11e   :  { %3275 = vmatprep.mubr.msk.f32.mxu0 %vm64_vm0, %v3929_v22  ;;  %v4215_v16 = vpop.f32.mrb[22].mxu1  ;;  %3572 = vmatpush3.bf16.msra.mxu0 %v3569_v57 }
 0x11f   :  { %v4217_v19 = vpop.f32.mrb[23].mxu1  ;;  %3582 = vmatprep.subr.bf16.mxu0 %v3905_v18 }
 0x121   :  { %3276 = vmatmul.mubr.msk.f32.gmra.mrb[36].mxu0 %vm64_vm0, %v3942_v23 }
 0x122   :  { %3278 = vmatprep.mubr.msk.f32.mxu0 %vm64_vm0, %v3949_v24  ;;  %v4219_v34 = vpop.f32.mrb[24].mxu1 }
 0x123   :  { %v4221_v36 = vpop.f32.mrb[25].mxu1 }
 0x125   :  { %3279 = vmatmul.mubr.msk.f32.gmra.mrb[38].mxu0 %vm64_vm0, %v3961_v25 }
 0x126   :  { %3281 = vmatprep.mubr.msk.f32.mxu0 %vm64_vm0, %v3968_v26  ;;  %v4229_v41 = vpop.f32.mrb[26].mxu1 }
 0x127   :  { %v4231_v47 = vpop.f32.mrb[27].mxu1 }
 0x129   :  { %3282 = vmatmul.mubr.msk.f32.gmra.mrb[40].mxu0 %vm64_vm0, %v3979_v27 }
 0x12a   :  { %3284 = vmatprep.mubr.msk.f32.mxu0 %vm64_vm0, %v3986_v28  ;;  %v4236_v50 = vpop.f32.mrb[28].mxu1 }
 0x12b   :  { %v4244_v54 = vpop.f32.mrb[29].mxu1 }
 0x12d   :  { %3285 = vmatmul.mubr.msk.f32.gmra.mrb[42].mxu0 %vm64_vm0, %v3997_v29 }
 0x12e   :  { %3287 = vmatprep.mubr.msk.f32.mxu0 %vm64_vm0, %v4004_v30  ;;  %v4246_v58 = vpop.f32.mrb[30].mxu1 }
 0x12f   :  { %v4248_v60 = vpop.f32.mrb[31].mxu1 }
 0x131   :  { %3288 = vmatmul.mubr.msk.f32.gmra.mrb[44].mxu0 %vm64_vm0, %v4015_v31 }
 0x132   :  { %3290 = vmatprep.mubr.msk.f32.mxu0 %vm64_vm0, %v4022_v32 }
 0x135   :  { %3291 = vmatmul.mubr.msk.f32.gmra.mrb[46].mxu0 %vm64_vm0, %v4033_v33 }
 0x136   :  { %3333 = vmatprep.mubr.msk.f32.mxu0 %vm64_vm0, %v3880_v11 }
 0x139   :  { %3334 = vmatmul.mubr.msk.f32.vlgmr.msra.gmra.mrb[48].mxu0 %vm64_vm0, %v3889_v13 }
 0x13a   :  { %3336 = vmatprep.mubr.msk.f32.mxu0 %vm64_vm0, %v3903_v17  ;;  %3584 = vmatpush3.bf16.msra.mxu0 %v3905_v18 }
 0x13b   :  { %3586 = vmatprep.subr.bf16.mxu0 %v3910_v20 }
 0x13d   :  { %3337 = vmatmul.mubr.msk.f32.gmra.mrb[50].mxu0 %vm64_vm0, %v3922_v21 }
 0x13e   :  { %3339 = vmatprep.mubr.msk.f32.mxu0 %vm64_vm0, %v3929_v22  ;;  %3588 = vmatpush3.bf16.msra.mxu0 %v3910_v20 }
 0x141   :  { %3340 = vmatmul.mubr.msk.f32.gmra.mrb[52].mxu0 %vm64_vm0, %v3942_v23 }
 0x142   :  { %3342 = vmatprep.mubr.msk.f32.mxu0 %vm64_vm0, %v3949_v24 }
 0x145   :  { %3343 = vmatmul.mubr.msk.f32.gmra.mrb[54].mxu0 %vm64_vm0, %v3961_v25 }
 0x146   :  { %3345 = vmatprep.mubr.msk.f32.mxu0 %vm64_vm0, %v3968_v26 }
 0x149   :  { %3346 = vmatmul.mubr.msk.f32.gmra.mrb[56].mxu0 %vm64_vm0, %v3979_v27 }
 0x14a   :  { %3348 = vmatprep.mubr.msk.f32.mxu0 %vm64_vm0, %v3986_v28 }
 0x14d   :  { %3349 = vmatmul.mubr.msk.f32.gmra.mrb[58].mxu0 %vm64_vm0, %v3997_v29 }
 0x14e   :  { %3351 = vmatprep.mubr.msk.f32.mxu0 %vm64_vm0, %v4004_v30 }
 0x151   :  { %3352 = vmatmul.mubr.msk.f32.gmra.mrb[60].mxu0 %vm64_vm0, %v4015_v31 }
 0x152   :  { %3354 = vmatprep.mubr.msk.f32.mxu0 %vm64_vm0, %v4022_v32 }
 0x155   :  { %3355 = vmatmul.mubr.msk.f32.gmra.mrb[62].mxu0 %vm64_vm0, %v4033_v33 }
 0x1cc   :  { %v3207_v61 = vpop.f32.mrb[16].mxu0 }
 0x1cd   :  { %v633_v62 = vmul.f32 0.125, %v3207_v61  ;;  %v553_v0 = vpop.f32.mrb[17].mxu0 }
 0x1ce   :  { %v632_v4 = vmul.f32 0.125, %v553_v0 }
 0x1cf   :  { %v649_v5 = vadd.f32 1e-05, %v633_v62 }
 0x1d0   :  { %v648_v38 = vadd.f32 1e-05, %v632_v4  ;;  %v3210_v39 = vpop.f32.mrb[18].mxu0 }
 0x1d1   :  { %3617 = vrsqrt.f32 %v649_v5  ;;  %v635_v40 = vmul.f32 0.125, %v3210_v39  ;;  %v563_v42 = vpop.f32.mrb[19].mxu0 }
 0x1d2   :  { %3619 = vrsqrt.f32 %v648_v38  ;;  %v634_v44 = vmul.f32 0.125, %v563_v42  ;;  %v4287_v38 = vld [vmem:[%s5080_s4] ss:$0 sm:$0xff] }
 0x1d3   :  { %v651_v51 = vadd.f32 1e-05, %v635_v40 }
 0x1d4   :  { %v650_v52 = vadd.f32 1e-05, %v634_v44  ;;  %v3213_v57 = vpop.f32.mrb[20].mxu0 }
 0x1d5   :  { %3621 = vrsqrt.f32 %v651_v51  ;;  %v637_v20 = vmul.f32 0.125, %v3213_v57  ;;  %v573_v18 = vpop.f32.mrb[21].mxu0 }
 0x1d6   :  { %3623 = vrsqrt.f32 %v650_v52  ;;  %v636_v33 = vmul.f32 0.125, %v573_v18 }
 0x1d7   :  { %v653_v32 = vadd.f32 1e-05, %v637_v20  ;;  %v4293_v20 = vld [vmem:[%s5081_s5] ss:$0 sm:$0xff] }
 0x1d8   :  { %v652_v61 = vadd.f32 1e-05, %v636_v33  ;;  %v3216_v31 = vpop.f32.mrb[22].mxu0 }
 0x1d9   :  { %3625 = vrsqrt.f32 %v653_v32  ;;  %v639_v62 = vmul.f32 0.125, %v3216_v31  ;;  %v583_v0 = vpop.f32.mrb[23].mxu0 }
 0x1da   :  { %3627 = vrsqrt.f32 %v652_v61  ;;  %v638_v4 = vmul.f32 0.125, %v583_v0 }
 0x1db   :  { %v3618_v5 = vpop.eup %3617  ;;  %v655_v39 = vadd.f32 1e-05, %v639_v62 }
 0x1dc   :  { %v3620_v40 = vpop.eup %3619  ;;  %v681_v42 = vmul.f32 %v3618_v5, %v4089_v46  ;;  %v654_v44 = vadd.f32 1e-05, %v638_v4  ;;  %v3219_v18 = vpop.f32.mrb[24].mxu0 }
 0x1dd   :  { %v680_v31 = vmul.f32 %v3620_v40, %v4091_v48  ;;  %3629 = vrsqrt.f32 %v655_v39  ;;  %v641_v32 = vmul.f32 0.125, %v3219_v18  ;;  %v593_v33 = vpop.f32.mrb[25].mxu0 }
 0x1de   :  { %v703_v51 = vmul.f32 %v4287_v38, %v681_v42  ;;  %3631 = vrsqrt.f32 %v654_v44  ;;  %v640_v52 = vmul.f32 0.125, %v593_v33 }
 0x1df   :  { %v3622_v57 = vpop.eup %3621  ;;  %v702_v61 = vmul.f32 %v4287_v38, %v680_v31  ;;  %v657_v46 = vadd.f32 1e-05, %v641_v32 }
 0x1e0   :  { %v3624_v62 = vpop.eup %3623  ;;  %v725_v0 = vadd.f32 %v4293_v20, %v703_v51  ;;  %v683_v4 = vmul.f32 %v3622_v57, %v4097_v56  ;;  %v656_v5 = vadd.f32 1e-05, %v640_v52  ;;  %v3222_v30 = vpop.f32.mrb[26].mxu0 }
 0x1e1   :  { %v724_v48 = vadd.f32 %v4293_v20, %v702_v61  ;;  %v682_v39 = vmul.f32 %v3624_v62, %v4099_v59  ;;  %3633 = vrsqrt.f32 %v657_v46  ;;  %v643_v40 = vmul.f32 0.125, %v3222_v30  ;;  %v603_v42 = vpop.f32.mrb[27].mxu0 }
 0x1e2   :  { %741 = vst.msk [vmem:[#allocation5 + $0x20] sm:$0xff] %vm64_vm0, %v725_v0  ;;  %v705_v44 = vmul.f32 %v4287_v38, %v683_v4  ;;  %3635 = vrsqrt.f32 %v656_v5  ;;  %v642_v18 = vmul.f32 0.125, %v603_v42 }
 0x1e3   :  { %v3626_v31 = vpop.eup %3625  ;;  %740 = vst.msk [vmem:[#allocation5] sm:$0xff] %vm64_vm0, %v724_v48  ;;  %v704_v56 = vmul.f32 %v4287_v38, %v682_v39  ;;  %v659_v32 = vadd.f32 1e-05, %v643_v40 }
 0x1e4   :  { %v3628_v33 = vpop.eup %3627  ;;  %v727_v51 = vadd.f32 %v4293_v20, %v705_v44  ;;  %v685_v59 = vmul.f32 %v3626_v31, %v4107_v1  ;;  %v658_v52 = vadd.f32 1e-05, %v642_v18  ;;  %v3225_v30 = vpop.f32.mrb[28].mxu0 }
 0x1e5   :  { %v726_v57 = vadd.f32 %v4293_v20, %v704_v56  ;;  %v684_v61 = vmul.f32 %v3628_v33, %v4109_v3  ;;  %3637 = vrsqrt.f32 %v659_v32  ;;  %v645_v46 = vmul.f32 0.125, %v3225_v30  ;;  %v613_v62 = vpop.f32.mrb[29].mxu0 }
 0x1e6   :  { %743 = vst.msk [vmem:[#allocation5 + $0x60] sm:$0xff] %vm64_vm0, %v727_v51  ;;  %v707_v0 = vmul.f32 %v4287_v38, %v685_v59  ;;  %3639 = vrsqrt.f32 %v658_v52  ;;  %v644_v4 = vmul.f32 0.125, %v613_v62 }
 0x1e7   :  { %v3630_v5 = vpop.eup %3629  ;;  %742 = vst.msk [vmem:[#allocation5 + $0x40] sm:$0xff] %vm64_vm0, %v726_v57  ;;  %v706_v1 = vmul.f32 %v4287_v38, %v684_v61  ;;  %v661_v48 = vadd.f32 1e-05, %v645_v46 }
 0x1e8   :  { %v3632_v39 = vpop.eup %3631  ;;  %v729_v40 = vadd.f32 %v4293_v20, %v707_v0  ;;  %v687_v3 = vmul.f32 %v3630_v5, %v4117_v9  ;;  %v660_v42 = vadd.f32 1e-05, %v644_v4  ;;  %v3228_v44 = vpop.f32.mrb[30].mxu0 }
 0x1e9   :  { %v728_v18 = vadd.f32 %v4293_v20, %v706_v1  ;;  %v686_v31 = vmul.f32 %v3632_v39, %v4119_v12  ;;  %3641 = vrsqrt.f32 %v661_v48  ;;  %v647_v56 = vmul.f32 0.125, %v3228_v44  ;;  %v623_v32 = vpop.f32.mrb[31].mxu0  ;;  %v1547_v1 = vld [vmem:[#allocation2 + $0x50] sm:$0xff]  ;;  %v1548_v48 = vld [vmem:[#allocation2 + $0x58] sm:$0xff] }
 0x1ea   :  { %745 = vst.msk [vmem:[#allocation5 + $0xa0] sm:$0xff] %vm64_vm0, %v729_v40  ;;  %v709_v33 = vmul.f32 %v4287_v38, %v687_v3  ;;  %3643 = vrsqrt.f32 %v660_v42  ;;  %v646_v51 = vmul.f32 0.125, %v623_v32 }
 0x1eb   :  { %v3634_v59 = vpop.eup %3633  ;;  %744 = vst.msk [vmem:[#allocation5 + $0x80] sm:$0xff] %vm64_vm0, %v728_v18  ;;  %v708_v9 = vmul.f32 %v4287_v38, %v686_v31  ;;  %v663_v52 = vadd.f32 1e-05, %v647_v56  ;;  %v3577_v31 = vpack.c.bf16 %v1548_v48, %v1547_v1 }
 0x1ec   :  { %v3636_v30 = vpop.eup %3635  ;;  %v731_v57 = vadd.f32 %v4293_v20, %v709_v33  ;;  %v689_v12 = vmul.f32 %v3634_v59, %v4127_v35  ;;  %v662_v61 = vadd.f32 1e-05, %v646_v51  ;;  %v3271_v46 = vpop.f32.mrb[32].mxu0 }
 0x1ed   :  { %v730_v62 = vadd.f32 %v4293_v20, %v708_v9  ;;  %v688_v0 = vmul.f32 %v3636_v30, %v4129_v37  ;;  %3645 = vrsqrt.f32 %v663_v52  ;;  %v4327_v4 = vsub.f32 %v4203_v6, %v3271_v46  ;;  %v977_v5 = vpop.f32.mrb[33].mxu0 }
 0x1ee   :  { %747 = vst.msk [vmem:[#allocation5 + $0xe0] sm:$0xff] %vm64_vm0, %v731_v57  ;;  %v711_v39 = vmul.f32 %v4287_v38, %v689_v12  ;;  %3647 = vrsqrt.f32 %v662_v61  ;;  %v4332_v35 = vsub.f32 %v4205_v7, %v977_v5 }
 0x1ef   :  { %v3638_v40 = vpop.eup %3637  ;;  %746 = vst.msk [vmem:[#allocation5 + $0xc0] sm:$0xff] %vm64_vm0, %v730_v62  ;;  %v710_v37 = vmul.f32 %v4287_v38, %v688_v0  ;;  %v1073_v32 = vmul.f32 %v4327_v4, %v4327_v4 }
 0x1f0   :  { %v3640_v3 = vpop.eup %3639  ;;  %v733_v6 = vadd.f32 %v4293_v20, %v711_v39  ;;  %v691_v42 = vmul.f32 %v3638_v40, %v4137_v43  ;;  %v1072_v44 = vmul.f32 %v4332_v35, %v4332_v35  ;;  %v3274_v18 = vpop.f32.mrb[34].mxu0 }
 0x1f1   :  { %v732_v56 = vadd.f32 %v4293_v20, %v710_v37  ;;  %v690_v7 = vmul.f32 %v3640_v3, %v4139_v45  ;;  %v4345_v33 = vsub.f32 %v4207_v8, %v3274_v18  ;;  %v987_v51 = vpop.f32.mrb[35].mxu0 }
 0x1f2   :  { %749 = vst.msk [vmem:[#allocation5 + $0x120] sm:$0xff] %vm64_vm0, %v733_v6  ;;  %v713_v43 = vmul.f32 %v4287_v38, %v691_v42  ;;  %v4350_v59 = vsub.f32 %v4209_v10, %v987_v51  ;;  %3301 = vmatprep.mubr.msk.f32.mxu1 %vm64_vm0, %v1072_v44 }
 0x1f3   :  { %v3642_v9 = vpop.eup %3641  ;;  %748 = vst.msk [vmem:[#allocation5 + $0x100] sm:$0xff] %vm64_vm0, %v732_v56  ;;  %v712_v45 = vmul.f32 %v4287_v38, %v690_v7  ;;  %3302 = vmatmul.mubr.msk.f32.vlgmr.msra.gmra.mrb[32].mxu1 %vm64_vm0, %v1073_v32  ;;  %v1075_v46 = vmul.f32 %v4345_v33, %v4345_v33 }
 0x1f4   :  { %v3644_v52 = vpop.eup %3643  ;;  %v735_v8 = vadd.f32 %v4293_v20, %v713_v43  ;;  %v693_v30 = vmul.f32 %v3642_v9, %v4147_v53  ;;  %v1074_v57 = vmul.f32 %v4350_v59, %v4350_v59  ;;  %3576 = vmatpush3.bf16.msra.mxu1 %v4233_v49  ;;  %v3277_v10 = vpop.f32.mrb[36].mxu0 }
 0x1f5   :  { %v734_v12 = vadd.f32 %v4293_v20, %v712_v45  ;;  %v692_v61 = vmul.f32 %v3644_v52, %v4149_v55  ;;  %v4366_v62 = vsub.f32 %v4211_v14, %v3277_v10  ;;  %v997_v0 = vpop.f32.mrb[37].mxu0  ;;  %3578 = vmatprep.subr.bf16.mxu1 %v3577_v31 }
 0x1f6   :  { %751 = vst.msk [vmem:[#allocation5 + $0x160] sm:$0xff] %vm64_vm0, %v735_v8  ;;  %v715_v53 = vmul.f32 %v4287_v38, %v693_v30  ;;  %v4371_v5 = vsub.f32 %v4213_v15, %v997_v0  ;;  %3304 = vmatprep.mubr.msk.f32.mxu1 %vm64_vm0, %v1074_v57 }
 0x1f7   :  { %v3646_v49 = vpop.eup %3645  ;;  %750 = vst.msk [vmem:[#allocation5 + $0x140] sm:$0xff] %vm64_vm0, %v734_v12  ;;  %v714_v55 = vmul.f32 %v4287_v38, %v692_v61  ;;  %3305 = vmatmul.mubr.msk.f32.gmra.mrb[34].mxu1 %vm64_vm0, %v1075_v46  ;;  %v1077_v3 = vmul.f32 %v4366_v62, %v4366_v62 }
 0x1f8   :  { %v3648_v14 = vpop.eup %3647  ;;  %v737_v1 = vadd.f32 %v4293_v20, %v715_v53  ;;  %v695_v48 = vmul.f32 %v3646_v49, %v4157_v63  ;;  %v1076_v39 = vmul.f32 %v4371_v5, %v4371_v5  ;;  %v3280_v40 = vpop.f32.mrb[38].mxu0  ;;  %3580 = vmatpush3.bf16.msra.mxu1 %v3577_v31 }
 0x1f9   :  { %v736_v15 = vadd.f32 %v4293_v20, %v714_v55  ;;  %v694_v37 = vmul.f32 %v3648_v14, %v4159_v2  ;;  %v4386_v6 = vsub.f32 %v4215_v16, %v3280_v40  ;;  %v1007_v42 = vpop.f32.mrb[39].mxu0  ;;  %v5103_v55 = vld [vmem:[#allocation12_spill] sm:$0xff]  ;;  %v5104_v14 = vld [vmem:[#allocation13_spill] sm:$0xff] }
 0x1fa   :  { %753 = vst.msk [vmem:[#allocation5 + $0x1a0] sm:$0xff] %vm64_vm0, %v737_v1  ;;  %v717_v63 = vmul.f32 %v4287_v38, %v695_v48  ;;  %v4391_v44 = vsub.f32 %v4217_v19, %v1007_v42  ;;  %3307 = vmatprep.mubr.msk.f32.mxu1 %vm64_vm0, %v1076_v39 }
 0x1fb   :  { %752 = vst.msk [vmem:[#allocation5 + $0x180] sm:$0xff] %vm64_vm0, %v736_v15  ;;  %v716_v2 = vmul.f32 %v4287_v38, %v694_v37  ;;  %3308 = vmatmul.mubr.msk.f32.gmra.mrb[36].mxu1 %vm64_vm0, %v1077_v3  ;;  %v1079_v19 = vmul.f32 %v4386_v6, %v4386_v6 }
 0x1fc   :  { %v739_v18 = vadd.f32 %v4293_v20, %v717_v63  ;;  %v1078_v16 = vmul.f32 %v4391_v44, %v4391_v44  ;;  %v3283_v31 = vpop.f32.mrb[40].mxu0 }
 0x1fd   :  { %v738_v56 = vadd.f32 %v4293_v20, %v716_v2  ;;  %v4404_v7 = vsub.f32 %v4219_v34, %v3283_v31  ;;  %v1017_v32 = vpop.f32.mrb[41].mxu0 }
 0x1fe   :  { %755 = vst.msk [vmem:[#allocation5 + $0x1e0] sm:$0xff] %vm64_vm0, %v739_v18  ;;  %v4408_v51 = vsub.f32 %v4221_v36, %v1017_v32  ;;  %3310 = vmatprep.mubr.msk.f32.mxu1 %vm64_vm0, %v1078_v16  ;;  %v2842_v18 = vld [vmem:[%s5077_s1 + $0x68] sm:$0xff]  ;;  %v2183_v16 = vld [vmem:[#allocation2 + $0x60] sm:$0xff] }
 0x1ff   :  { %754 = vst.msk [vmem:[#allocation5 + $0x1c0] sm:$0xff] %vm64_vm0, %v738_v56  ;;  %3311 = vmatmul.mubr.msk.f32.gmra.mrb[38].mxu1 %vm64_vm0, %v1079_v19  ;;  %v1081_v34 = vmul.f32 %v4404_v7, %v4404_v7  ;;  %v2184_v19 = vld [vmem:[#allocation2 + $0x68] sm:$0xff] }
 0x200   :  { %v1080_v43 = vmul.f32 %v4408_v51, %v4408_v51  ;;  %v3286_v9 = vpop.f32.mrb[42].mxu0 }
 0x201   :  { %v4418_v45 = vsub.f32 %v4229_v41, %v3286_v9  ;;  %v1027_v52 = vpop.f32.mrb[43].mxu0 }
 0x202   :  { %v4421_v36 = vsub.f32 %v4231_v47, %v1027_v52  ;;  %3313 = vmatprep.mubr.msk.f32.mxu1 %vm64_vm0, %v1080_v43  ;;  %v4519_v43 = vpack.c.bf16 %v2184_v19, %v2183_v16  ;;  %v2844_v52 = vld [vmem:[%s5077_s1 + $0x78] sm:$0xff] }
 0x203   :  { %3314 = vmatmul.mubr.msk.f32.gmra.mrb[40].mxu1 %vm64_vm0, %v1081_v34  ;;  %v1083_v57 = vmul.f32 %v4418_v45, %v4418_v45  ;;  %v2843_v34 = vld [vmem:[%s5077_s1 + $0x70] sm:$0xff] }
 0x204   :  { %v1082_v8 = vmul.f32 %v4421_v36, %v4421_v36  ;;  %v3289_v30 = vpop.f32.mrb[44].mxu0  ;;  %3598 = vmatprep.subr.bf16.mxu0 %v4519_v43 }
 0x205   :  { %v4430_v10 = vsub.f32 %v4236_v50, %v3289_v30  ;;  %v1037_v41 = vpop.f32.mrb[45].mxu0  ;;  %v3593_v30 = vpack.c.bf16 %v2844_v52, %v2843_v34 }
 0x206   :  { %v4433_v12 = vsub.f32 %v4244_v54, %v1037_v41  ;;  %3316 = vmatprep.mubr.msk.f32.mxu1 %vm64_vm0, %v1082_v8 }
 0x207   :  { %3317 = vmatmul.mubr.msk.f32.gmra.mrb[42].mxu1 %vm64_vm0, %v1083_v57  ;;  %v1085_v46 = vmul.f32 %v4430_v10, %v4430_v10 }
 0x208   :  { %v1084_v47 = vmul.f32 %v4433_v12, %v4433_v12  ;;  %v3292_v61 = vpop.f32.mrb[46].mxu0 }
 0x209   :  { %v4442_v0 = vsub.f32 %v4246_v58, %v3292_v61  ;;  %v1047_v50 = vpop.f32.mrb[47].mxu0  ;;  %v5101_v58 = vld [vmem:[#allocation10_spill] sm:$0xff]  ;;  %v5106_v61 = vld [vmem:[#allocation9_spill] sm:$0xff] }
 0x20a   :  { %v4445_v53 = vsub.f32 %v4248_v60, %v1047_v50  ;;  %3319 = vmatprep.mubr.msk.f32.mxu1 %vm64_vm0, %v1084_v47  ;;  %v5102_v60 = vld [vmem:[#allocation11_spill] sm:$0xff]  ;;  %v5105_v47 = vld [vmem:[#allocation8_spill] sm:$0xff] }
 0x20b   :  { %3320 = vmatmul.mubr.msk.f32.gmra.mrb[44].mxu1 %vm64_vm0, %v1085_v46  ;;  %v1087_v49 = vmul.f32 %v4442_v0, %v4442_v0 }
 0x20c   :  { %v1086_v54 = vmul.f32 %v4445_v53, %v4445_v53  ;;  %v4489_v1 = vpop.f32.mrb[48].mxu0 }
 0x20d   :  { %v4491_v48 = vpop.f32.mrb[49].mxu0 }
 0x20e   :  { %3322 = vmatprep.mubr.msk.f32.mxu1 %vm64_vm0, %v1086_v54 }
 0x20f   :  { %3323 = vmatmul.mubr.msk.f32.gmra.mrb[46].mxu1 %vm64_vm0, %v1087_v49 }
 0x210   :  { %3365 = vmatprep.mubr.msk.f32.mxu1 %vm64_vm0, %v3880_v11  ;;  %v4493_v39 = vpop.f32.mrb[50].mxu0 }
 0x211   :  { %v4495_v40 = vpop.f32.mrb[51].mxu0 }
 0x213   :  { %3366 = vmatmul.mubr.msk.f32.vlgmr.msra.gmra.mrb[48].mxu1 %vm64_vm0, %v3889_v13 }
 0x214   :  { %3368 = vmatprep.mubr.msk.f32.mxu1 %vm64_vm0, %v3903_v17  ;;  %v4497_v15 = vpop.f32.mrb[52].mxu0 }
 0x215   :  { %v4499_v37 = vpop.f32.mrb[53].mxu0 }
 0x217   :  { %3369 = vmatmul.mubr.msk.f32.gmra.mrb[50].mxu1 %vm64_vm0, %v3922_v21 }
 0x218   :  { %3371 = vmatprep.mubr.msk.f32.mxu1 %vm64_vm0, %v3929_v22  ;;  %v4501_v3 = vpop.f32.mrb[54].mxu0 }
 0x219   :  { %v4503_v42 = vpop.f32.mrb[55].mxu0 }
 0x21b   :  { %3372 = vmatmul.mubr.msk.f32.gmra.mrb[52].mxu1 %vm64_vm0, %v3942_v23 }
 0x21c   :  { %3374 = vmatprep.mubr.msk.f32.mxu1 %vm64_vm0, %v3949_v24  ;;  %v4505_v63 = vpop.f32.mrb[56].mxu0 }
 0x21d   :  { %v4507_v2 = vpop.f32.mrb[57].mxu0 }
 0x21f   :  { %3375 = vmatmul.mubr.msk.f32.gmra.mrb[54].mxu1 %vm64_vm0, %v3961_v25 }
 0x220   :  { %3377 = vmatprep.mubr.msk.f32.mxu1 %vm64_vm0, %v3968_v26  ;;  %v4515_v31 = vpop.f32.mrb[58].mxu0 }
 0x221   :  { %v4517_v32 = vpop.f32.mrb[59].mxu0 }
 0x223   :  { %3378 = vmatmul.mubr.msk.f32.gmra.mrb[56].mxu1 %vm64_vm0, %v3979_v27 }
 0x224   :  { %3380 = vmatprep.mubr.msk.f32.mxu1 %vm64_vm0, %v3986_v28  ;;  %v4522_v9 = vpop.f32.mrb[60].mxu0 }
 0x225   :  { %v4530_v8 = vpop.f32.mrb[61].mxu0 }
 0x227   :  { %3381 = vmatmul.mubr.msk.f32.gmra.mrb[58].mxu1 %vm64_vm0, %v3997_v29 }
 0x228   :  { %3383 = vmatprep.mubr.msk.f32.mxu1 %vm64_vm0, %v5101_v58  ;;  %v4532_v57 = vpop.f32.mrb[62].mxu0 }
 0x229   :  { %v4534_v41 = vpop.f32.mrb[63].mxu0 }
 0x22b   :  { %3384 = vmatmul.mubr.msk.f32.gmra.mrb[60].mxu1 %vm64_vm0, %v5102_v60 }
 0x22c   :  { %3386 = vmatprep.mubr.msk.f32.mxu1 %vm64_vm0, %v5103_v55 }
 0x22f   :  { %3387 = vmatmul.mubr.msk.f32.gmra.mrb[62].mxu1 %vm64_vm0, %v5104_v14 }
 0x230   :  { %3429 = vmatprep.mubr.msk.f32.mxu1 %vm64_vm0, %v3880_v11  ;;  %v2841_v11 = vld [vmem:[%s5077_s1 + $0x60] sm:$0xff] }
 0x231   :  { %v3589_v56 = vpack.c.bf16 %v2842_v18, %v2841_v11 }
 0x233   :  { %3590 = vmatprep.subr.bf16.mxu1 %v3589_v56 }
 0x234   :  { %3592 = vmatpush3.bf16.msra.mxu1 %v3589_v56 }
 0x235   :  { %3594 = vmatprep.subr.bf16.mxu1 %v3593_v30 }
 0x238   :  { %3596 = vmatpush3.bf16.msra.mxu1 %v3593_v30 }
 0x239   :  { %3606 = vmatprep.subr.bf16.mxu1 %v5105_v47 }
 0x23b   :  { %3430 = vmatmul.mubr.msk.f32.vlgmr.msra.gmra.mrb[64].mxu1 %vm64_vm0, %v3889_v13 }
 0x23c   :  { %3432 = vmatprep.mubr.msk.f32.mxu1 %vm64_vm0, %v3903_v17  ;;  %3608 = vmatpush3.bf16.msra.mxu1 %v5105_v47 }
 0x23d   :  { %3610 = vmatprep.subr.bf16.mxu1 %v5106_v61 }
 0x23f   :  { %3433 = vmatmul.mubr.msk.f32.gmra.mrb[66].mxu1 %vm64_vm0, %v3922_v21 }
 0x240   :  { %3435 = vmatprep.mubr.msk.f32.mxu1 %vm64_vm0, %v3929_v22  ;;  %3612 = vmatpush3.bf16.msra.mxu1 %v5106_v61 }
 0x243   :  { %3436 = vmatmul.mubr.msk.f32.gmra.mrb[68].mxu1 %vm64_vm0, %v3942_v23 }
 0x244   :  { %3438 = vmatprep.mubr.msk.f32.mxu1 %vm64_vm0, %v3949_v24 }
 0x247   :  { %3439 = vmatmul.mubr.msk.f32.gmra.mrb[70].mxu1 %vm64_vm0, %v3961_v25 }
 0x248   :  { %3441 = vmatprep.mubr.msk.f32.mxu1 %vm64_vm0, %v3968_v26 }
 0x24b   :  { %3442 = vmatmul.mubr.msk.f32.gmra.mrb[72].mxu1 %vm64_vm0, %v3979_v27 }
 0x24c   :  { %3444 = vmatprep.mubr.msk.f32.mxu1 %vm64_vm0, %v3986_v28 }
 0x24f   :  { %3445 = vmatmul.mubr.msk.f32.gmra.mrb[74].mxu1 %vm64_vm0, %v3997_v29 }
 0x250   :  { %3447 = vmatprep.mubr.msk.f32.mxu1 %vm64_vm0, %v5101_v58 }
 0x253   :  { %3448 = vmatmul.mubr.msk.f32.gmra.mrb[76].mxu1 %vm64_vm0, %v5102_v60 }
 0x254   :  { %3450 = vmatprep.mubr.msk.f32.mxu1 %vm64_vm0, %v5103_v55 }
 0x257   :  { %3451 = vmatmul.mubr.msk.f32.gmra.mrb[78].mxu1 %vm64_vm0, %v5104_v14 }
 0x2c6   :  { %v3303_v13 = vpop.f32.mrb[32].mxu1 }
 0x2c7   :  { %v1282_v17 = vmul.f32 0.125, %v3303_v13  ;;  %v1202_v21 = vpop.f32.mrb[33].mxu1 }
 0x2c8   :  { %v1281_v22 = vmul.f32 0.125, %v1202_v21 }
 0x2c9   :  { %v1298_v23 = vadd.f32 1e-05, %v1282_v17 }
 0x2ca   :  { %v1297_v24 = vadd.f32 1e-05, %v1281_v22  ;;  %v3306_v25 = vpop.f32.mrb[34].mxu1 }
 0x2cb   :  { %3649 = vrsqrt.f32 %v1298_v23  ;;  %v1284_v26 = vmul.f32 0.125, %v3306_v25  ;;  %v1212_v27 = vpop.f32.mrb[35].mxu1 }
 0x2cc   :  { %3651 = vrsqrt.f32 %v1297_v24  ;;  %v1283_v28 = vmul.f32 0.125, %v1212_v27 }
 0x2cd   :  { %v1300_v29 = vadd.f32 1e-05, %v1284_v26 }
 0x2ce   :  { %v1299_v46 = vadd.f32 1e-05, %v1283_v28  ;;  %v3309_v50 = vpop.f32.mrb[36].mxu1 }
 0x2cf   :  { %3653 = vrsqrt.f32 %v1300_v29  ;;  %v1286_v54 = vmul.f32 0.125, %v3309_v50  ;;  %v1222_v49 = vpop.f32.mrb[37].mxu1 }
 0x2d0   :  { %3655 = vrsqrt.f32 %v1299_v46  ;;  %v1285_v58 = vmul.f32 0.125, %v1222_v49 }
 0x2d1   :  { %v1302_v60 = vadd.f32 1e-05, %v1286_v54 }
 0x2d2   :  { %v1301_v55 = vadd.f32 1e-05, %v1285_v58  ;;  %v3312_v14 = vpop.f32.mrb[38].mxu1 }
 0x2d3   :  { %3657 = vrsqrt.f32 %v1302_v60  ;;  %v1288_v11 = vmul.f32 0.125, %v3312_v14  ;;  %v1232_v18 = vpop.f32.mrb[39].mxu1 }
 0x2d4   :  { %3659 = vrsqrt.f32 %v1301_v55  ;;  %v1287_v16 = vmul.f32 0.125, %v1232_v18 }
 0x2d5   :  { %v3650_v56 = vpop.eup %3649  ;;  %v1304_v19 = vadd.f32 1e-05, %v1288_v11 }
 0x2d6   :  { %v3652_v34 = vpop.eup %3651  ;;  %v1330_v52 = vmul.f32 %v3650_v56, %v4327_v4  ;;  %v1303_v30 = vadd.f32 1e-05, %v1287_v16  ;;  %v3315_v47 = vpop.f32.mrb[40].mxu1 }
 0x2d7   :  { %v1329_v61 = vmul.f32 %v3652_v34, %v4332_v35  ;;  %3661 = vrsqrt.f32 %v1304_v19  ;;  %v1290_v13 = vmul.f32 0.125, %v3315_v47  ;;  %v1242_v17 = vpop.f32.mrb[41].mxu1 }
 0x2d8   :  { %v1346_v21 = vmul.f32 %v4287_v38, %v1330_v52  ;;  %3663 = vrsqrt.f32 %v1303_v30  ;;  %v1289_v22 = vmul.f32 0.125, %v1242_v17 }
 0x2d9   :  { %v3654_v23 = vpop.eup %3653  ;;  %v1345_v24 = vmul.f32 %v4287_v38, %v1329_v61  ;;  %v1306_v25 = vadd.f32 1e-05, %v1290_v13 }
 0x2da   :  { %v3656_v26 = vpop.eup %3655  ;;  %v1362_v27 = vadd.f32 %v4293_v20, %v1346_v21  ;;  %v1332_v4 = vmul.f32 %v3654_v23, %v4345_v33  ;;  %v1305_v28 = vadd.f32 1e-05, %v1289_v22  ;;  %v3318_v29 = vpop.f32.mrb[42].mxu1 }
 0x2db   :  { %v1361_v35 = vadd.f32 %v4293_v20, %v1345_v24  ;;  %v1331_v46 = vmul.f32 %v3656_v26, %v4350_v59  ;;  %3665 = vrsqrt.f32 %v1306_v25  ;;  %v1292_v50 = vmul.f32 0.125, %v3318_v29  ;;  %v1252_v54 = vpop.f32.mrb[43].mxu1 }
 0x2dc   :  { %1379 = vst.msk [vmem:[#allocation5 + $0x28] sm:$0xff] %vm64_vm0, %v1362_v27  ;;  %v1348_v49 = vmul.f32 %v4287_v38, %v1332_v4  ;;  %3667 = vrsqrt.f32 %v1305_v28  ;;  %v1291_v58 = vmul.f32 0.125, %v1252_v54 }
 0x2dd   :  { %v3658_v60 = vpop.eup %3657  ;;  %1378 = vst.msk [vmem:[#allocation5 + $0x8] sm:$0xff] %vm64_vm0, %v1361_v35  ;;  %v1347_v33 = vmul.f32 %v4287_v38, %v1331_v46  ;;  %v1308_v55 = vadd.f32 1e-05, %v1292_v50 }
 0x2de   :  { %v3660_v14 = vpop.eup %3659  ;;  %v1364_v11 = vadd.f32 %v4293_v20, %v1348_v49  ;;  %v1334_v59 = vmul.f32 %v3658_v60, %v4366_v62  ;;  %v1307_v18 = vadd.f32 1e-05, %v1291_v58  ;;  %v3321_v16 = vpop.f32.mrb[44].mxu1 }
 0x2df   :  { %v1363_v56 = vadd.f32 %v4293_v20, %v1347_v33  ;;  %v1333_v19 = vmul.f32 %v3660_v14, %v4371_v5  ;;  %3669 = vrsqrt.f32 %v1308_v55  ;;  %v1294_v34 = vmul.f32 0.125, %v3321_v16  ;;  %v1262_v52 = vpop.f32.mrb[45].mxu1  ;;  %v2185_v14 = vld [vmem:[#allocation2 + $0x70] sm:$0xff] }
 0x2e0   :  { %1381 = vst.msk [vmem:[#allocation5 + $0x68] sm:$0xff] %vm64_vm0, %v1364_v11  ;;  %v1350_v30 = vmul.f32 %v4287_v38, %v1334_v59  ;;  %3671 = vrsqrt.f32 %v1307_v18  ;;  %v1293_v47 = vmul.f32 0.125, %v1262_v52  ;;  %v2186_v11 = vld [vmem:[#allocation2 + $0x78] sm:$0xff] }
 0x2e1   :  { %v3662_v61 = vpop.eup %3661  ;;  %1380 = vst.msk [vmem:[#allocation5 + $0x48] sm:$0xff] %vm64_vm0, %v1363_v56  ;;  %v1349_v62 = vmul.f32 %v4287_v38, %v1333_v19  ;;  %v1310_v13 = vadd.f32 1e-05, %v1294_v34  ;;  %v3601_v52 = vpack.c.bf16 %v2186_v11, %v2185_v14 }
 0x2e2   :  { %v3664_v17 = vpop.eup %3663  ;;  %v1366_v21 = vadd.f32 %v4293_v20, %v1350_v30  ;;  %v1336_v5 = vmul.f32 %v3662_v61, %v4386_v6  ;;  %v1309_v22 = vadd.f32 1e-05, %v1293_v47  ;;  %v3324_v23 = vpop.f32.mrb[46].mxu1 }
 0x2e3   :  { %v1365_v24 = vadd.f32 %v4293_v20, %v1349_v62  ;;  %v1335_v25 = vmul.f32 %v3664_v17, %v4391_v44  ;;  %3673 = vrsqrt.f32 %v1310_v13  ;;  %v1296_v26 = vmul.f32 0.125, %v3324_v23  ;;  %v1272_v27 = vpop.f32.mrb[47].mxu1 }
 0x2e4   :  { %1383 = vst.msk [vmem:[#allocation5 + $0xa8] sm:$0xff] %vm64_vm0, %v1366_v21  ;;  %v1352_v4 = vmul.f32 %v4287_v38, %v1336_v5  ;;  %3675 = vrsqrt.f32 %v1309_v22  ;;  %v1295_v28 = vmul.f32 0.125, %v1272_v27 }
 0x2e5   :  { %v3666_v29 = vpop.eup %3665  ;;  %1382 = vst.msk [vmem:[#allocation5 + $0x88] sm:$0xff] %vm64_vm0, %v1365_v24  ;;  %v1351_v6 = vmul.f32 %v4287_v38, %v1335_v25  ;;  %v1312_v35 = vadd.f32 1e-05, %v1296_v26 }
 0x2e6   :  { %v3668_v46 = vpop.eup %3667  ;;  %v1368_v50 = vadd.f32 %v4293_v20, %v1352_v4  ;;  %v1338_v44 = vmul.f32 %v3666_v29, %v4404_v7  ;;  %v1311_v54 = vadd.f32 1e-05, %v1295_v28  ;;  %v3367_v49 = vpop.f32.mrb[48].mxu1 }
 0x2e7   :  { %v1367_v58 = vadd.f32 %v4293_v20, %v1351_v6  ;;  %v1337_v60 = vmul.f32 %v3668_v46, %v4408_v51  ;;  %3677 = vrsqrt.f32 %v1312_v35  ;;  %v4603_v33 = vsub.f32 %v4489_v1, %v3367_v49  ;;  %v1615_v55 = vpop.f32.mrb[49].mxu1 }
 0x2e8   :  { %1385 = vst.msk [vmem:[#allocation5 + $0xe8] sm:$0xff] %vm64_vm0, %v1368_v50  ;;  %v1354_v59 = vmul.f32 %v4287_v38, %v1338_v44  ;;  %3679 = vrsqrt.f32 %v1311_v54  ;;  %v4608_v7 = vsub.f32 %v4491_v48, %v1615_v55 }
 0x2e9   :  { %v3670_v18 = vpop.eup %3669  ;;  %1384 = vst.msk [vmem:[#allocation5 + $0xc8] sm:$0xff] %vm64_vm0, %v1367_v58  ;;  %v1353_v51 = vmul.f32 %v4287_v38, %v1337_v60  ;;  %v1711_v47 = vmul.f32 %v4603_v33, %v4603_v33 }
 0x2ea   :  { %v3672_v16 = vpop.eup %3671  ;;  %v1370_v1 = vadd.f32 %v4293_v20, %v1354_v59  ;;  %v1340_v56 = vmul.f32 %v3670_v18, %v4418_v45  ;;  %v1710_v19 = vmul.f32 %v4608_v7, %v4608_v7  ;;  %v3370_v34 = vpop.f32.mrb[50].mxu1 }
 0x2eb   :  { %v1369_v30 = vadd.f32 %v4293_v20, %v1353_v51  ;;  %v1339_v48 = vmul.f32 %v3672_v16, %v4421_v36  ;;  %v4621_v61 = vsub.f32 %v4493_v39, %v3370_v34  ;;  %v1625_v62 = vpop.f32.mrb[51].mxu1 }
 0x2ec   :  { %1387 = vst.msk [vmem:[#allocation5 + $0x128] sm:$0xff] %vm64_vm0, %v1370_v1  ;;  %v1356_v45 = vmul.f32 %v4287_v38, %v1340_v56  ;;  %v4626_v13 = vsub.f32 %v4495_v40, %v1625_v62  ;;  %3397 = vmatprep.mubr.msk.f32.mxu0 %vm64_vm0, %v1710_v19 }
 0x2ed   :  { %v3674_v17 = vpop.eup %3673  ;;  %1386 = vst.msk [vmem:[#allocation5 + $0x108] sm:$0xff] %vm64_vm0, %v1369_v30  ;;  %v1355_v36 = vmul.f32 %v4287_v38, %v1339_v48  ;;  %3398 = vmatmul.mubr.msk.f32.vlgmr.msra.gmra.mrb[64].mxu0 %vm64_vm0, %v1711_v47  ;;  %v1713_v25 = vmul.f32 %v4621_v61, %v4621_v61 }
 0x2ee   :  { %v3676_v21 = vpop.eup %3675  ;;  %v1372_v39 = vadd.f32 %v4293_v20, %v1356_v45  ;;  %v1342_v5 = vmul.f32 %v3674_v17, %v4430_v10  ;;  %v1712_v22 = vmul.f32 %v4626_v13, %v4626_v13  ;;  %3600 = vmatpush3.bf16.msra.mxu0 %v4519_v43  ;;  %v3373_v40 = vpop.f32.mrb[52].mxu1  ;;  %v3747_v45 = vld [vmem:[%s5076_s0 + $0x10] sm:$0xff]  ;;  %v3748_v17 = vld [vmem:[%s5076_s0 + $0x18] sm:$0xff] }
 0x2ef   :  { %v1371_v23 = vadd.f32 %v4293_v20, %v1355_v36  ;;  %v1341_v24 = vmul.f32 %v3676_v21, %v4433_v12  ;;  %v4642_v26 = vsub.f32 %v4497_v15, %v3373_v40  ;;  %v1635_v27 = vpop.f32.mrb[53].mxu1  ;;  %3602 = vmatprep.subr.bf16.mxu0 %v3601_v52  ;;  %v3749_v36 = vld [vmem:[%s5076_s0 + $0x20] sm:$0xff]  ;;  %v3750_v21 = vld [vmem:[%s5076_s0 + $0x28] sm:$0xff] }
 0x2f0   :  { %1389 = vst.msk [vmem:[#allocation5 + $0x168] sm:$0xff] %vm64_vm0, %v1372_v39  ;;  %v1358_v10 = vmul.f32 %v4287_v38, %v1342_v5  ;;  %v4647_v4 = vsub.f32 %v4499_v37, %v1635_v27  ;;  %3400 = vmatprep.mubr.msk.f32.mxu0 %vm64_vm0, %v1712_v22  ;;  %v3751_v39 = vld [vmem:[%s5076_s0 + $0x30] sm:$0xff]  ;;  %v3752_v5 = vld [vmem:[%s5076_s0 + $0x38] sm:$0xff]  ;;  %v3753_v22 = vld [vmem:[%s5076_s0 + $0x40] sm:$0xff] }
 0x2f1   :  { %v3678_v43 = vpop.eup %3677  ;;  %1388 = vst.msk [vmem:[#allocation5 + $0x148] sm:$0xff] %vm64_vm0, %v1371_v23  ;;  %v1357_v12 = vmul.f32 %v4287_v38, %v1341_v24  ;;  %3401 = vmatmul.mubr.msk.f32.gmra.mrb[66].mxu0 %vm64_vm0, %v1713_v25  ;;  %v1715_v50 = vmul.f32 %v4642_v26, %v4642_v26  ;;  %v3754_v40 = vld [vmem:[%s5076_s0 + $0x48] sm:$0xff]  ;;  %v3755_v23 = vld [vmem:[%s5076_s0 + $0x50] sm:$0xff]  ;;  %v3756_v24 = vld [vmem:[%s5076_s0 + $0x58] sm:$0xff] }
 0x2f2   :  { %v3680_v15 = vpop.eup %3679  ;;  %v1374_v28 = vadd.f32 %v4293_v20, %v1358_v10  ;;  %v1344_v29 = vmul.f32 %v3678_v43, %v4442_v0  ;;  %v1714_v6 = vmul.f32 %v4647_v4, %v4647_v4  ;;  %v3376_v35 = vpop.f32.mrb[54].mxu1  ;;  %3604 = vmatpush3.bf16.msra.mxu0 %v3601_v52  ;;  %v3757_v25 = vld [vmem:[%s5076_s0 + $0x60] sm:$0xff]  ;;  %v3758_v27 = vld [vmem:[%s5076_s0 + $0x68] sm:$0xff]  ;;  %v3759_v10 = vld [vmem:[%s5076_s0 + $0x70] sm:$0xff] }
 0x2f3   :  { %v1373_v37 = vadd.f32 %v4293_v20, %v1357_v12  ;;  %v1343_v46 = vmul.f32 %v3680_v15, %v4445_v53  ;;  %v4662_v44 = vsub.f32 %v4501_v3, %v3376_v35  ;;  %v1645_v54 = vpop.f32.mrb[55].mxu1  ;;  %v3760_v43 = vld [vmem:[%s5076_s0 + $0x78] sm:$0xff] }
 0x2f4   :  { %1391 = vst.msk [vmem:[#allocation5 + $0x1a8] sm:$0xff] %vm64_vm0, %v1374_v28  ;;  %v1360_v0 = vmul.f32 %v4287_v38, %v1344_v29  ;;  %v4667_v49 = vsub.f32 %v4503_v42, %v1645_v54  ;;  %3403 = vmatprep.mubr.msk.f32.mxu0 %vm64_vm0, %v1714_v6 }
 0x2f5   :  { %1390 = vst.msk [vmem:[#allocation5 + $0x188] sm:$0xff] %vm64_vm0, %v1373_v37  ;;  %v1359_v53 = vmul.f32 %v4287_v38, %v1343_v46  ;;  %3404 = vmatmul.mubr.msk.f32.gmra.mrb[68].mxu0 %vm64_vm0, %v1715_v50  ;;  %v1717_v42 = vmul.f32 %v4662_v44, %v4662_v44 }
 0x2f6   :  { %v1376_v58 = vadd.f32 %v4293_v20, %v1360_v0  ;;  %v1716_v3 = vmul.f32 %v4667_v49, %v4667_v49  ;;  %v3379_v60 = vpop.f32.mrb[56].mxu1 }
 0x2f7   :  { %v1375_v55 = vadd.f32 %v4293_v20, %v1359_v53  ;;  %v4680_v14 = vsub.f32 %v4505_v63, %v3379_v60  ;;  %v1655_v11 = vpop.f32.mrb[57].mxu1 }
 0x2f8   :  { %1393 = vst.msk [vmem:[#allocation5 + $0x1e8] sm:$0xff] %vm64_vm0, %v1376_v58  ;;  %v4684_v38 = vsub.f32 %v4507_v2, %v1655_v11  ;;  %3406 = vmatprep.mubr.msk.f32.mxu0 %vm64_vm0, %v1716_v3 }
 0x2f9   :  { %1392 = vst.msk [vmem:[#allocation5 + $0x1c8] sm:$0xff] %vm64_vm0, %v1375_v55  ;;  %3407 = vmatmul.mubr.msk.f32.gmra.mrb[70].mxu0 %vm64_vm0, %v1717_v42  ;;  %v1719_v63 = vmul.f32 %v4680_v14, %v4680_v14 }
 0x2fa   :  { %v1718_v20 = vmul.f32 %v4684_v38, %v4684_v38  ;;  %v3382_v59 = vpop.f32.mrb[58].mxu1 }
 0x2fb   :  { %v4694_v18 = vsub.f32 %v4515_v31, %v3382_v59  ;;  %v1665_v51 = vpop.f32.mrb[59].mxu1 }
 0x2fc   :  { %v4697_v2 = vsub.f32 %v4517_v32, %v1665_v51  ;;  %3409 = vmatprep.mubr.msk.f32.mxu0 %vm64_vm0, %v1718_v20 }
 0x2fd   :  { %3410 = vmatmul.mubr.msk.f32.gmra.mrb[72].mxu0 %vm64_vm0, %v1719_v63  ;;  %v1721_v56 = vmul.f32 %v4694_v18, %v4694_v18 }
 0x2fe   :  { %v1720_v16 = vmul.f32 %v4697_v2, %v4697_v2  ;;  %v3385_v1 = vpop.f32.mrb[60].mxu1 }
 0x2ff   :  { %v4706_v19 = vsub.f32 %v4522_v9, %v3385_v1  ;;  %v1675_v31 = vpop.f32.mrb[61].mxu1 }
 0x300   :  { %v4709_v34 = vsub.f32 %v4530_v8, %v1675_v31  ;;  %3412 = vmatprep.mubr.msk.f32.mxu0 %vm64_vm0, %v1720_v16 }
 0x301   :  { %3413 = vmatmul.mubr.msk.f32.gmra.mrb[74].mxu0 %vm64_vm0, %v1721_v56  ;;  %v1723_v30 = vmul.f32 %v4706_v19, %v4706_v19 }
 0x302   :  { %v1722_v32 = vmul.f32 %v4709_v34, %v4709_v34  ;;  %v3388_v52 = vpop.f32.mrb[62].mxu1 }
 0x303   :  { %v4718_v48 = vsub.f32 %v4532_v57, %v3388_v52  ;;  %v1685_v9 = vpop.f32.mrb[63].mxu1  ;;  %v3745_v57 = vld [vmem:[%s5076_s0] sm:$0xff] }
 0x304   :  { %v4721_v47 = vsub.f32 %v4534_v41, %v1685_v9  ;;  %3415 = vmatprep.mubr.msk.f32.mxu0 %vm64_vm0, %v1722_v32  ;;  %v3746_v41 = vld [vmem:[%s5076_s0 + $0x8] sm:$0xff] }
 0x305   :  { %3416 = vmatmul.mubr.msk.f32.gmra.mrb[76].mxu0 %vm64_vm0, %v1723_v30  ;;  %v1725_v62 = vmul.f32 %v4718_v48, %v4718_v48 }
 0x306   :  { %v1724_v8 = vmul.f32 %v4721_v47, %v4721_v47 }
 0x308   :  { %3418 = vmatprep.mubr.msk.f32.mxu0 %vm64_vm0, %v1724_v8 }
 0x309   :  { %3419 = vmatmul.mubr.msk.f32.gmra.mrb[78].mxu0 %vm64_vm0, %v1725_v62 }
 0x30a   :  { %3461 = vmatprep.mubr.msk.f32.mxu0 %vm64_vm0, %v3745_v57 }
 0x30d   :  { %3462 = vmatmul.mubr.msk.f32.vlgmr.msra.gmra.mrb[80].mxu0 %vm64_vm0, %v3746_v41 }
 0x30e   :  { %3464 = vmatprep.mubr.msk.f32.mxu0 %vm64_vm0, %v3747_v45  ;;  %v4795_v12 = vpop.f32.mrb[64].mxu1 }
 0x30f   :  { %v4797_v15 = vpop.f32.mrb[65].mxu1 }
 0x311   :  { %3465 = vmatmul.mubr.msk.f32.gmra.mrb[82].mxu0 %vm64_vm0, %v3748_v17 }
 0x312   :  { %3467 = vmatprep.mubr.msk.f32.mxu0 %vm64_vm0, %v3749_v36  ;;  %v4799_v28 = vpop.f32.mrb[66].mxu1 }
 0x313   :  { %v4801_v29 = vpop.f32.mrb[67].mxu1 }
 0x315   :  { %3468 = vmatmul.mubr.msk.f32.gmra.mrb[84].mxu0 %vm64_vm0, %v3750_v21 }
 0x316   :  { %3470 = vmatprep.mubr.msk.f32.mxu0 %vm64_vm0, %v3751_v39  ;;  %v4803_v6 = vpop.f32.mrb[68].mxu1 }
 0x317   :  { %v4805_v35 = vpop.f32.mrb[69].mxu1 }
 0x319   :  { %3471 = vmatmul.mubr.msk.f32.gmra.mrb[86].mxu0 %vm64_vm0, %v3752_v5 }
 0x31a   :  { %3473 = vmatprep.mubr.msk.f32.mxu0 %vm64_vm0, %v3753_v22  ;;  %v4807_v37 = vpop.f32.mrb[70].mxu1 }
 0x31b   :  { %v4809_v46 = vpop.f32.mrb[71].mxu1 }
 0x31d   :  { %3474 = vmatmul.mubr.msk.f32.gmra.mrb[88].mxu0 %vm64_vm0, %v3754_v40 }
 0x31e   :  { %3476 = vmatprep.mubr.msk.f32.mxu0 %vm64_vm0, %v3755_v23  ;;  %v4811_v50 = vpop.f32.mrb[72].mxu1 }
 0x31f   :  { %v4813_v54 = vpop.f32.mrb[73].mxu1 }
 0x321   :  { %3477 = vmatmul.mubr.msk.f32.gmra.mrb[90].mxu0 %vm64_vm0, %v3756_v24 }
 0x322   :  { %3479 = vmatprep.mubr.msk.f32.mxu0 %vm64_vm0, %v3757_v25  ;;  %v4815_v0 = vpop.f32.mrb[74].mxu1 }
 0x323   :  { %v4817_v53 = vpop.f32.mrb[75].mxu1 }
 0x325   :  { %3480 = vmatmul.mubr.msk.f32.gmra.mrb[92].mxu0 %vm64_vm0, %v3758_v27 }
 0x326   :  { %3482 = vmatprep.mubr.msk.f32.mxu0 %vm64_vm0, %v3759_v10  ;;  %v4819_v58 = vpop.f32.mrb[76].mxu1 }
 0x327   :  { %v4821_v3 = vpop.f32.mrb[77].mxu1 }
 0x329   :  { %3483 = vmatmul.mubr.msk.f32.gmra.mrb[94].mxu0 %vm64_vm0, %v3760_v43  ;;  %v4832_v43 = vld [vmem:[%s5080_s4] ss:$0 sm:$0xff]  ;;  %s3814_s4 = smov [#allocation5]  }
 0x32a   :  { %v4823_v60 = vpop.f32.mrb[78].mxu1 }
 0x32b   :  { %v4825_v55 = vpop.f32.mrb[79].mxu1 }
 0x3c0   :  { %v3399_v42 = vpop.f32.mrb[64].mxu0 }
 0x3c1   :  { %v1920_v11 = vmul.f32 0.125, %v3399_v42  ;;  %v1840_v20 = vpop.f32.mrb[65].mxu0 }
 0x3c2   :  { %v1919_v59 = vmul.f32 0.125, %v1840_v20 }
 0x3c3   :  { %v1936_v63 = vadd.f32 1e-05, %v1920_v11 }
 0x3c4   :  { %v1935_v51 = vadd.f32 1e-05, %v1919_v59  ;;  %v3402_v16 = vpop.f32.mrb[66].mxu0 }
 0x3c5   :  { %3681 = vrsqrt.f32 %v1936_v63  ;;  %v1922_v1 = vmul.f32 0.125, %v3402_v16  ;;  %v1850_v56 = vpop.f32.mrb[67].mxu0 }
 0x3c6   :  { %3683 = vrsqrt.f32 %v1935_v51  ;;  %v1921_v31 = vmul.f32 0.125, %v1850_v56 }
 0x3c7   :  { %v1938_v32 = vadd.f32 1e-05, %v1922_v1 }
 0x3c8   :  { %v1937_v52 = vadd.f32 1e-05, %v1921_v31  ;;  %v3405_v30 = vpop.f32.mrb[68].mxu0 }
 0x3c9   :  { %3685 = vrsqrt.f32 %v1938_v32  ;;  %v1924_v9 = vmul.f32 0.125, %v3405_v30  ;;  %v1860_v8 = vpop.f32.mrb[69].mxu0 }
 0x3ca   :  { %3687 = vrsqrt.f32 %v1937_v52  ;;  %v1923_v62 = vmul.f32 0.125, %v1860_v8 }
 0x3cb   :  { %v1940_v57 = vadd.f32 1e-05, %v1924_v9 }
 0x3cc   :  { %v1939_v41 = vadd.f32 1e-05, %v1923_v62  ;;  %v3408_v45 = vpop.f32.mrb[70].mxu0 }
 0x3cd   :  { %3689 = vrsqrt.f32 %v1940_v57  ;;  %v1926_v17 = vmul.f32 0.125, %v3408_v45  ;;  %v1870_v36 = vpop.f32.mrb[71].mxu0 }
 0x3ce   :  { %3691 = vrsqrt.f32 %v1939_v41  ;;  %v1925_v21 = vmul.f32 0.125, %v1870_v36 }
 0x3cf   :  { %v3682_v39 = vpop.eup %3681  ;;  %v1942_v5 = vadd.f32 1e-05, %v1926_v17 }
 0x3d0   :  { %v3684_v22 = vpop.eup %3683  ;;  %v1968_v40 = vmul.f32 %v3682_v39, %v4603_v33  ;;  %v1941_v23 = vadd.f32 1e-05, %v1925_v21  ;;  %v3411_v24 = vpop.f32.mrb[72].mxu0 }
 0x3d1   :  { %v1967_v25 = vmul.f32 %v3684_v22, %v4608_v7  ;;  %3693 = vrsqrt.f32 %v1942_v5  ;;  %v1928_v27 = vmul.f32 0.125, %v3411_v24  ;;  %v1880_v10 = vpop.f32.mrb[73].mxu0  ;;  %v4839_v7 = vld [vmem:[%s5081_s5] ss:$0 sm:$0xff]  ;;  %s2675_s5 = sshll.u32 %s3814_s4, 4  ;;  %s2676_s5 = int_to_ptr.vmem [resolvable:$true] %s2675_s5 }
 0x3d2   :  { %v1984_v42 = vmul.f32 %v4832_v43, %v1968_v40  ;;  %3695 = vrsqrt.f32 %v1941_v23  ;;  %v1927_v11 = vmul.f32 0.125, %v1880_v10  ;;  %s3785_s23 = scalar_lea.vmem %s2676_s5, 8192  ;;  %p3790_p9 = scmp.lt.s32.totalorder %s2676_s5, %s2676_s5 }
 0x3d3   :  { %v3686_v20 = vpop.eup %3685  ;;  %v1983_v59 = vmul.f32 %v4832_v43, %v1967_v25  ;;  %v1944_v33 = vadd.f32 1e-05, %v1928_v27  ;;  %p3786_p8 = scmp.ne.s32.totalorder %s2676_s5, %s3785_s23  ;;  %p3791_p10 = scmp.lt.s32.totalorder %s3785_s23, %s3785_s23 }
 0x3d4   :  { %v3688_v63 = vpop.eup %3687  ;;  %v2000_v51 = vadd.f32 %v4839_v7, %v1984_v42  ;;  %v1970_v16 = vmul.f32 %v3686_v20, %v4621_v61  ;;  %v1943_v1 = vadd.f32 1e-05, %v1927_v11  ;;  %v3414_v56 = vpop.f32.mrb[74].mxu0 }
 0x3d5   :  { %v1999_v31 = vadd.f32 %v4839_v7, %v1983_v59  ;;  %v1969_v32 = vmul.f32 %v3688_v63, %v4626_v13  ;;  %3697 = vrsqrt.f32 %v1944_v33  ;;  %v1930_v52 = vmul.f32 0.125, %v3414_v56  ;;  %v1890_v30 = vpop.f32.mrb[75].mxu0  ;;  %p3792_p11 = por %p3791_p10, %p3790_p9 }
 0x3d6   :  { %2017 = vst.msk [vmem:[#allocation5 + $0x30] sm:$0xff] %vm64_vm0, %v2000_v51  ;;  %v1986_v9 = vmul.f32 %v4832_v43, %v1970_v16  ;;  %3699 = vrsqrt.f32 %v1943_v1  ;;  %v1929_v8 = vmul.f32 0.125, %v1890_v30 }
 0x3d7   :  { %v3690_v62 = vpop.eup %3689  ;;  %2016 = vst.msk [vmem:[#allocation5 + $0x10] sm:$0xff] %vm64_vm0, %v1999_v31  ;;  %v1985_v61 = vmul.f32 %v4832_v43, %v1969_v32  ;;  %v1946_v57 = vadd.f32 1e-05, %v1930_v52  ;;  %p3793_p12 = pnand %p3792_p11, %p3786_p8 }
 0x3d8   :  { %v3692_v41 = vpop.eup %3691  ;;  %v2002_v45 = vadd.f32 %v4839_v7, %v1986_v9  ;;  %v1972_v13 = vmul.f32 %v3690_v62, %v4642_v26  ;;  %v1945_v17 = vadd.f32 1e-05, %v1929_v8  ;;  %v3417_v36 = vpop.f32.mrb[76].mxu0 }
 0x3d9   :  { %v2001_v21 = vadd.f32 %v4839_v7, %v1985_v61  ;;  %v1971_v39 = vmul.f32 %v3692_v41, %v4647_v4  ;;  %3701 = vrsqrt.f32 %v1946_v57  ;;  %v1932_v5 = vmul.f32 0.125, %v3417_v36  ;;  %v1900_v22 = vpop.f32.mrb[77].mxu0 }
 0x3da   :  { %2019 = vst.msk [vmem:[#allocation5 + $0x70] sm:$0xff] %vm64_vm0, %v2002_v45  ;;  %v1988_v40 = vmul.f32 %v4832_v43, %v1972_v13  ;;  %3703 = vrsqrt.f32 %v1945_v17  ;;  %v1931_v23 = vmul.f32 0.125, %v1900_v22 }
 0x3db   :  { %v3694_v24 = vpop.eup %3693  ;;  %2018 = vst.msk [vmem:[#allocation5 + $0x50] sm:$0xff] %vm64_vm0, %v2001_v21  ;;  %v1987_v26 = vmul.f32 %v4832_v43, %v1971_v39  ;;  %v1948_v25 = vadd.f32 1e-05, %v1932_v5 }
 0x3dc   :  { %v3696_v27 = vpop.eup %3695  ;;  %v2004_v10 = vadd.f32 %v4839_v7, %v1988_v40  ;;  %v1974_v4 = vmul.f32 %v3694_v24, %v4662_v44  ;;  %v1947_v42 = vadd.f32 1e-05, %v1931_v23  ;;  %v3420_v11 = vpop.f32.mrb[78].mxu0 }
 0x3dd   :  { %v2003_v20 = vadd.f32 %v4839_v7, %v1987_v26  ;;  %v1973_v59 = vmul.f32 %v3696_v27, %v4667_v49  ;;  %3705 = vrsqrt.f32 %v1948_v25  ;;  %v1934_v33 = vmul.f32 0.125, %v3420_v11  ;;  %v1910_v63 = vpop.f32.mrb[79].mxu0 }
 0x3de   :  { %2021 = vst.msk [vmem:[#allocation5 + $0xb0] sm:$0xff] %vm64_vm0, %v2004_v10  ;;  %v1990_v51 = vmul.f32 %v4832_v43, %v1974_v4  ;;  %3707 = vrsqrt.f32 %v1947_v42  ;;  %v1933_v16 = vmul.f32 0.125, %v1910_v63 }
 0x3df   :  { %v3698_v1 = vpop.eup %3697  ;;  %2020 = vst.msk [vmem:[#allocation5 + $0x90] sm:$0xff] %vm64_vm0, %v2003_v20  ;;  %v1989_v44 = vmul.f32 %v4832_v43, %v1973_v59  ;;  %v1950_v56 = vadd.f32 1e-05, %v1934_v33 }
 0x3e0   :  { %v3700_v31 = vpop.eup %3699  ;;  %v2006_v32 = vadd.f32 %v4839_v7, %v1990_v51  ;;  %v1976_v49 = vmul.f32 %v3698_v1, %v4680_v14  ;;  %v1949_v52 = vadd.f32 1e-05, %v1933_v16  ;;  %v3463_v30 = vpop.f32.mrb[80].mxu0 }
 0x3e1   :  { %v2005_v9 = vadd.f32 %v4839_v7, %v1989_v44  ;;  %v1975_v8 = vmul.f32 %v3700_v31, %v4684_v38  ;;  %3709 = vrsqrt.f32 %v1950_v56  ;;  %v4870_v62 = vsub.f32 %v4795_v12, %v3463_v30  ;;  %v2253_v61 = vpop.f32.mrb[81].mxu0 }
 0x3e2   :  { %2023 = vst.msk [vmem:[#allocation5 + $0xf0] sm:$0xff] %vm64_vm0, %v2006_v32  ;;  %v1992_v57 = vmul.f32 %v4832_v43, %v1976_v49  ;;  %3711 = vrsqrt.f32 %v1949_v52  ;;  %v4875_v41 = vsub.f32 %v4797_v15, %v2253_v61 }
 0x3e3   :  { %v3702_v14 = vpop.eup %3701  ;;  %2022 = vst.msk [vmem:[#allocation5 + $0xd0] sm:$0xff] %vm64_vm0, %v2005_v9  ;;  %v1991_v45 = vmul.f32 %v4832_v43, %v1975_v8  ;;  %v2349_v15 = vmul.f32 %v4870_v62, %v4870_v62 }
 0x3e4   :  { %v3704_v13 = vpop.eup %3703  ;;  %v2008_v38 = vadd.f32 %v4839_v7, %v1992_v57  ;;  %v1978_v12 = vmul.f32 %v3702_v14, %v4694_v18  ;;  %v2348_v17 = vmul.f32 %v4875_v41, %v4875_v41  ;;  %v3466_v36 = vpop.f32.mrb[82].mxu0 }
 0x3e5   :  { %v2007_v21 = vadd.f32 %v4839_v7, %v1991_v45  ;;  %v1977_v39 = vmul.f32 %v3704_v13, %v4697_v2  ;;  %v4888_v5 = vsub.f32 %v4799_v28, %v3466_v36  ;;  %v2263_v22 = vpop.f32.mrb[83].mxu0 }
 0x3e6   :  { %2025 = vst.msk [vmem:[#allocation5 + $0x130] sm:$0xff] %vm64_vm0, %v2008_v38  ;;  %v1994_v40 = vmul.f32 %v4832_v43, %v1978_v12  ;;  %v4893_v18 = vsub.f32 %v4801_v29, %v2263_v22  ;;  %3493 = vmatprep.mubr.msk.f32.mxu1 %vm64_vm0, %v2348_v17 }
 0x3e7   :  { %v3706_v23 = vpop.eup %3705  ;;  %2024 = vst.msk [vmem:[#allocation5 + $0x110] sm:$0xff] %vm64_vm0, %v2007_v21  ;;  %v1993_v2 = vmul.f32 %v4832_v43, %v1977_v39  ;;  %3494 = vmatmul.mubr.msk.f32.vlgmr.msra.gmra.mrb[80].mxu1 %vm64_vm0, %v2349_v15  ;;  %v2351_v4 = vmul.f32 %v4888_v5, %v4888_v5 }
 0x3e8   :  { %v3708_v24 = vpop.eup %3707  ;;  %v2010_v28 = vadd.f32 %v4839_v7, %v1994_v40  ;;  %v1980_v26 = vmul.f32 %v3706_v23, %v4706_v19  ;;  %v2350_v25 = vmul.f32 %v4893_v18, %v4893_v18  ;;  %v3469_v27 = vpop.f32.mrb[84].mxu0 }
 0x3e9   :  { %v2009_v29 = vadd.f32 %v4839_v7, %v1993_v2  ;;  %v1979_v10 = vmul.f32 %v3708_v24, %v4709_v34  ;;  %v4908_v42 = vsub.f32 %v4803_v6, %v3469_v27  ;;  %v2273_v11 = vpop.f32.mrb[85].mxu0 }
 0x3ea   :  { %2027 = vst.msk [vmem:[#allocation5 + $0x170] sm:$0xff] %vm64_vm0, %v2010_v28  ;;  %v1996_v20 = vmul.f32 %v4832_v43, %v1980_v26  ;;  %v4913_v19 = vsub.f32 %v4805_v35, %v2273_v11  ;;  %3496 = vmatprep.mubr.msk.f32.mxu1 %vm64_vm0, %v2350_v25 }
 0x3eb   :  { %v3710_v59 = vpop.eup %3709  ;;  %2026 = vst.msk [vmem:[#allocation5 + $0x150] sm:$0xff] %vm64_vm0, %v2009_v29  ;;  %v1995_v34 = vmul.f32 %v4832_v43, %v1979_v10  ;;  %3497 = vmatmul.mubr.msk.f32.gmra.mrb[82].mxu1 %vm64_vm0, %v2351_v4  ;;  %v2353_v44 = vmul.f32 %v4908_v42, %v4908_v42 }
 0x3ec   :  { %v3712_v33 = vpop.eup %3711  ;;  %v2012_v6 = vadd.f32 %v4839_v7, %v1996_v20  ;;  %v1982_v63 = vmul.f32 %v3710_v59, %v4718_v48  ;;  %v2352_v51 = vmul.f32 %v4913_v19, %v4913_v19  ;;  %v3472_v16 = vpop.f32.mrb[86].mxu0 }
 0x3ed   :  { %v2011_v35 = vadd.f32 %v4839_v7, %v1995_v34  ;;  %v1981_v1 = vmul.f32 %v3712_v33, %v4721_v47  ;;  %v4928_v56 = vsub.f32 %v4807_v37, %v3472_v16  ;;  %v2283_v31 = vpop.f32.mrb[87].mxu0 }
 0x3ee   :  { %2029 = vst.msk [vmem:[#allocation5 + $0x1b0] sm:$0xff] %vm64_vm0, %v2012_v6  ;;  %v1998_v32 = vmul.f32 %v4832_v43, %v1982_v63  ;;  %v4933_v48 = vsub.f32 %v4809_v46, %v2283_v31  ;;  %3499 = vmatprep.mubr.msk.f32.mxu1 %vm64_vm0, %v2352_v51 }
 0x3ef   :  { %2028 = vst.msk [vmem:[#allocation5 + $0x190] sm:$0xff] %vm64_vm0, %v2011_v35  ;;  %v1997_v47 = vmul.f32 %v4832_v43, %v1981_v1  ;;  %3500 = vmatmul.mubr.msk.f32.gmra.mrb[84].mxu1 %vm64_vm0, %v2353_v44  ;;  %v2355_v46 = vmul.f32 %v4928_v56, %v4928_v56 }
 0x3f0   :  { %v2014_v49 = vadd.f32 %v4839_v7, %v1998_v32  ;;  %v2354_v37 = vmul.f32 %v4933_v48, %v4933_v48  ;;  %v3475_v52 = vpop.f32.mrb[88].mxu0 }
 0x3f1   :  { %v2013_v30 = vadd.f32 %v4839_v7, %v1997_v47  ;;  %v4946_v9 = vsub.f32 %v4811_v50, %v3475_v52  ;;  %v2293_v8 = vpop.f32.mrb[89].mxu0 }
 0x3f2   :  { %2031 = vst.msk [vmem:[#allocation5 + $0x1f0] sm:$0xff] %vm64_vm0, %v2014_v49  ;;  %v4950_v61 = vsub.f32 %v4813_v54, %v2293_v8  ;;  %3502 = vmatprep.mubr.msk.f32.mxu1 %vm64_vm0, %v2354_v37 }
 0x3f3   :  { %2030 = vst.msk [vmem:[#allocation5 + $0x1d0] sm:$0xff] %vm64_vm0, %v2013_v30  ;;  %3503 = vmatmul.mubr.msk.f32.gmra.mrb[86].mxu1 %vm64_vm0, %v2355_v46  ;;  %v2357_v50 = vmul.f32 %v4946_v9, %v4946_v9 }
 0x3f4   :  { %v2356_v57 = vmul.f32 %v4950_v61, %v4950_v61  ;;  %v3478_v14 = vpop.f32.mrb[90].mxu0 }
 0x3f5   :  { %v4960_v45 = vsub.f32 %v4815_v0, %v3478_v14  ;;  %v2303_v13 = vpop.f32.mrb[91].mxu0 }
 0x3f6   :  { %v4963_v54 = vsub.f32 %v4817_v53, %v2303_v13  ;;  %3505 = vmatprep.mubr.msk.f32.mxu1 %vm64_vm0, %v2356_v57 }
 0x3f7   :  { %3506 = vmatmul.mubr.msk.f32.gmra.mrb[88].mxu1 %vm64_vm0, %v2357_v50  ;;  %v2359_v17 = vmul.f32 %v4960_v45, %v4960_v45 }
 0x3f8   :  { %v2358_v38 = vmul.f32 %v4963_v54, %v4963_v54  ;;  %v3481_v12 = vpop.f32.mrb[92].mxu0 }
 0x3f9   :  { %v4972_v36 = vsub.f32 %v4819_v58, %v3481_v12  ;;  %v2313_v0 = vpop.f32.mrb[93].mxu0 }
 0x3fa   :  { %v4975_v21 = vsub.f32 %v4821_v3, %v2313_v0  ;;  %3508 = vmatprep.mubr.msk.f32.mxu1 %vm64_vm0, %v2358_v38 }
 0x3fb   :  { %3509 = vmatmul.mubr.msk.f32.gmra.mrb[90].mxu1 %vm64_vm0, %v2359_v17  ;;  %v2361_v15 = vmul.f32 %v4972_v36, %v4972_v36 }
 0x3fc   :  { %v2360_v53 = vmul.f32 %v4975_v21, %v4975_v21  ;;  %v3484_v39 = vpop.f32.mrb[94].mxu0 }
 0x3fd   :  { %v4984_v22 = vsub.f32 %v4823_v60, %v3484_v39  ;;  %v2323_v58 = vpop.f32.mrb[95].mxu0 }
 0x3fe   :  { %v4987_v40 = vsub.f32 %v4825_v55, %v2323_v58  ;;  %3511 = vmatprep.mubr.msk.f32.mxu1 %vm64_vm0, %v2360_v53 }
 0x3ff   :  { %3512 = vmatmul.mubr.msk.f32.gmra.mrb[92].mxu1 %vm64_vm0, %v2361_v15  ;;  %v2363_v23 = vmul.f32 %v4984_v22, %v4984_v22 }
 0x400   :  { %v2362_v3 = vmul.f32 %v4987_v40, %v4987_v40 }
 0x402   :  { %3514 = vmatprep.mubr.msk.f32.mxu1 %vm64_vm0, %v2362_v3 }
 0x403   :  { %3515 = vmatmul.mubr.msk.f32.gmra.mrb[94].mxu1 %vm64_vm0, %v2363_v23 }
 0x4ba   :  { %v3495_v60 = vpop.f32.mrb[80].mxu1 }
 0x4bb   :  { %v2558_v2 = vmul.f32 0.125, %v3495_v60  ;;  %v2478_v24 = vpop.f32.mrb[81].mxu1 }
 0x4bc   :  { %v2557_v28 = vmul.f32 0.125, %v2478_v24 }
 0x4bd   :  { %v2574_v55 = vadd.f32 1e-05, %v2558_v2 }
 0x4be   :  { %v2573_v26 = vadd.f32 1e-05, %v2557_v28  ;;  %v3498_v25 = vpop.f32.mrb[82].mxu1 }
 0x4bf   :  { %3713 = vrsqrt.f32 %v2574_v55  ;;  %v2560_v27 = vmul.f32 0.125, %v3498_v25  ;;  %v2488_v29 = vpop.f32.mrb[83].mxu1 }
 0x4c0   :  { %3715 = vrsqrt.f32 %v2573_v26  ;;  %v2559_v10 = vmul.f32 0.125, %v2488_v29 }
 0x4c1   :  { %v2576_v4 = vadd.f32 1e-05, %v2560_v27 }
 0x4c2   :  { %v2575_v11 = vadd.f32 1e-05, %v2559_v10  ;;  %v3501_v20 = vpop.f32.mrb[84].mxu1 }
 0x4c3   :  { %3717 = vrsqrt.f32 %v2576_v4  ;;  %v2562_v59 = vmul.f32 0.125, %v3501_v20  ;;  %v2498_v34 = vpop.f32.mrb[85].mxu1 }
 0x4c4   :  { %3719 = vrsqrt.f32 %v2575_v11  ;;  %v2561_v33 = vmul.f32 0.125, %v2498_v34 }
 0x4c5   :  { %v2578_v6 = vadd.f32 1e-05, %v2562_v59 }
 0x4c6   :  { %v2577_v63 = vadd.f32 1e-05, %v2561_v33  ;;  %v3504_v51 = vpop.f32.mrb[86].mxu1 }
 0x4c7   :  { %3721 = vrsqrt.f32 %v2578_v6  ;;  %v2564_v16 = vmul.f32 0.125, %v3504_v51  ;;  %v2508_v35 = vpop.f32.mrb[87].mxu1 }
 0x4c8   :  { %3723 = vrsqrt.f32 %v2577_v63  ;;  %v2563_v1 = vmul.f32 0.125, %v2508_v35 }
 0x4c9   :  { %v3714_v44 = vpop.eup %3713  ;;  %v2580_v31 = vadd.f32 1e-05, %v2564_v16 }
 0x4ca   :  { %v3716_v32 = vpop.eup %3715  ;;  %v2606_v47 = vmul.f32 %v3714_v44, %v4870_v62  ;;  %v2579_v49 = vadd.f32 1e-05, %v2563_v1  ;;  %v3507_v37 = vpop.f32.mrb[88].mxu1 }
 0x4cb   :  { %v2605_v52 = vmul.f32 %v3716_v32, %v4875_v41  ;;  %3725 = vrsqrt.f32 %v2580_v31  ;;  %v2566_v30 = vmul.f32 0.125, %v3507_v37  ;;  %v2518_v46 = vpop.f32.mrb[89].mxu1 }
 0x4cc   :  { %v2622_v8 = vmul.f32 %v4832_v43, %v2606_v47  ;;  %3727 = vrsqrt.f32 %v2579_v49  ;;  %v2565_v57 = vmul.f32 0.125, %v2518_v46 }
 0x4cd   :  { %v3718_v14 = vpop.eup %3717  ;;  %v2621_v50 = vmul.f32 %v4832_v43, %v2605_v52  ;;  %v2582_v13 = vadd.f32 1e-05, %v2566_v30 }
 0x4ce   :  { %v3720_v38 = vpop.eup %3719  ;;  %v2638_v12 = vadd.f32 %v4839_v7, %v2622_v8  ;;  %v2608_v62 = vmul.f32 %v3718_v14, %v4888_v5  ;;  %v2581_v17 = vadd.f32 1e-05, %v2565_v57  ;;  %v3510_v0 = vpop.f32.mrb[90].mxu1 }
 0x4cf   :  { %v2637_v41 = vadd.f32 %v4839_v7, %v2621_v50  ;;  %v2607_v53 = vmul.f32 %v3720_v38, %v4893_v18  ;;  %3729 = vrsqrt.f32 %v2582_v13  ;;  %v2568_v39 = vmul.f32 0.125, %v3510_v0  ;;  %v2528_v15 = vpop.f32.mrb[91].mxu1 }
 0x4d0   :  { %2655 = vst.msk [vmem:[#allocation5 + $0x38] sm:$0xff] %vm64_vm0, %v2638_v12  ;;  %v2624_v58 = vmul.f32 %v4832_v43, %v2608_v62  ;;  %3731 = vrsqrt.f32 %v2581_v17  ;;  %v2567_v3 = vmul.f32 0.125, %v2528_v15 }
 0x4d1   :  { %v3722_v23 = vpop.eup %3721  ;;  %2654 = vst.msk [vmem:[#allocation5 + $0x18] sm:$0xff] %vm64_vm0, %v2637_v41  ;;  %v2623_v5 = vmul.f32 %v4832_v43, %v2607_v53  ;;  %v2584_v60 = vadd.f32 1e-05, %v2568_v39 }
 0x4d2   :  { %v3724_v2 = vpop.eup %3723  ;;  %v2640_v24 = vadd.f32 %v4839_v7, %v2624_v58  ;;  %v2610_v18 = vmul.f32 %v3722_v23, %v4908_v42  ;;  %v2583_v28 = vadd.f32 1e-05, %v2567_v3  ;;  %v3513_v55 = vpop.f32.mrb[92].mxu1 }
 0x4d3   :  { %v2639_v26 = vadd.f32 %v4839_v7, %v2623_v5  ;;  %v2609_v25 = vmul.f32 %v3724_v2, %v4913_v19  ;;  %3733 = vrsqrt.f32 %v2584_v60  ;;  %v2570_v27 = vmul.f32 0.125, %v3513_v55  ;;  %v2538_v29 = vpop.f32.mrb[93].mxu1 }
 0x4d4   :  { %2657 = vst.msk [vmem:[#allocation5 + $0x78] sm:$0xff] %vm64_vm0, %v2640_v24  ;;  %v2626_v10 = vmul.f32 %v4832_v43, %v2610_v18  ;;  %3735 = vrsqrt.f32 %v2583_v28  ;;  %v2569_v4 = vmul.f32 0.125, %v2538_v29 }
 0x4d5   :  { %v3726_v11 = vpop.eup %3725  ;;  %2656 = vst.msk [vmem:[#allocation5 + $0x58] sm:$0xff] %vm64_vm0, %v2639_v26  ;;  %v2625_v42 = vmul.f32 %v4832_v43, %v2609_v25  ;;  %v2586_v20 = vadd.f32 1e-05, %v2570_v27 }
 0x4d6   :  { %v3728_v59 = vpop.eup %3727  ;;  %v2642_v34 = vadd.f32 %v4839_v7, %v2626_v10  ;;  %v2612_v19 = vmul.f32 %v3726_v11, %v4928_v56  ;;  %v2585_v33 = vadd.f32 1e-05, %v2569_v4  ;;  %v3516_v6 = vpop.f32.mrb[94].mxu1 }
 0x4d7   :  { %v2641_v63 = vadd.f32 %v4839_v7, %v2625_v42  ;;  %v2611_v51 = vmul.f32 %v3728_v59, %v4933_v48  ;;  %3737 = vrsqrt.f32 %v2586_v20  ;;  %v2572_v16 = vmul.f32 0.125, %v3516_v6  ;;  %v2548_v35 = vpop.f32.mrb[95].mxu1 }
 0x4d8   :  { %2659 = vst.msk [vmem:[#allocation5 + $0xb8] sm:$0xff] %vm64_vm0, %v2642_v34  ;;  %v2628_v1 = vmul.f32 %v4832_v43, %v2612_v19  ;;  %3739 = vrsqrt.f32 %v2585_v33  ;;  %v2571_v44 = vmul.f32 0.125, %v2548_v35 }
 0x4d9   :  { %v3730_v31 = vpop.eup %3729  ;;  %2658 = vst.msk [vmem:[#allocation5 + $0x98] sm:$0xff] %vm64_vm0, %v2641_v63  ;;  %v2627_v56 = vmul.f32 %v4832_v43, %v2611_v51  ;;  %v2588_v32 = vadd.f32 1e-05, %v2572_v16 }
 0x4da   :  { %v3732_v47 = vpop.eup %3731  ;;  %v2644_v49 = vadd.f32 %v4839_v7, %v2628_v1  ;;  %v2614_v48 = vmul.f32 %v3730_v31, %v4946_v9  ;;  %v2587_v37 = vadd.f32 1e-05, %v2571_v44 }
 0x4db   :  { %v2643_v52 = vadd.f32 %v4839_v7, %v2627_v56  ;;  %v2613_v30 = vmul.f32 %v3732_v47, %v4950_v61  ;;  %3741 = vrsqrt.f32 %v2588_v32 }
 0x4dc   :  { %2661 = vst.msk [vmem:[#allocation5 + $0xf8] sm:$0xff] %vm64_vm0, %v2644_v49  ;;  %v2630_v46 = vmul.f32 %v4832_v43, %v2614_v48  ;;  %3743 = vrsqrt.f32 %v2587_v37 }
 0x4dd   :  { %v3734_v8 = vpop.eup %3733  ;;  %2660 = vst.msk [vmem:[#allocation5 + $0xd8] sm:$0xff] %vm64_vm0, %v2643_v52  ;;  %v2629_v57 = vmul.f32 %v4832_v43, %v2613_v30 }
 0x4de   :  { %v3736_v14 = vpop.eup %3735  ;;  %v2646_v50 = vadd.f32 %v4839_v7, %v2630_v46  ;;  %v2616_v9 = vmul.f32 %v3734_v8, %v4960_v45 }
 0x4df   :  { %v2645_v13 = vadd.f32 %v4839_v7, %v2629_v57  ;;  %v2615_v61 = vmul.f32 %v3736_v14, %v4963_v54 }
 0x4e0   :  { %2663 = vst.msk [vmem:[#allocation5 + $0x138] sm:$0xff] %vm64_vm0, %v2646_v50  ;;  %v2632_v38 = vmul.f32 %v4832_v43, %v2616_v9 }
 0x4e1   :  { %v3738_v12 = vpop.eup %3737  ;;  %2662 = vst.msk [vmem:[#allocation5 + $0x118] sm:$0xff] %vm64_vm0, %v2645_v13  ;;  %v2631_v62 = vmul.f32 %v4832_v43, %v2615_v61 }
 0x4e2   :  { %v3740_v17 = vpop.eup %3739  ;;  %v2648_v0 = vadd.f32 %v4839_v7, %v2632_v38  ;;  %v2618_v41 = vmul.f32 %v3738_v12, %v4972_v36 }
 0x4e3   :  { %v2647_v45 = vadd.f32 %v4839_v7, %v2631_v62  ;;  %v2617_v53 = vmul.f32 %v3740_v17, %v4975_v21 }
 0x4e4   :  { %2665 = vst.msk [vmem:[#allocation5 + $0x178] sm:$0xff] %vm64_vm0, %v2648_v0  ;;  %v2634_v54 = vmul.f32 %v4832_v43, %v2618_v41 }
 0x4e5   :  { %v3742_v39 = vpop.eup %3741  ;;  %2664 = vst.msk [vmem:[#allocation5 + $0x158] sm:$0xff] %vm64_vm0, %v2647_v45  ;;  %v2633_v15 = vmul.f32 %v4832_v43, %v2617_v53 }
 0x4e6   :  { %v3744_v58 = vpop.eup %3743  ;;  %v2650_v3 = vadd.f32 %v4839_v7, %v2634_v54  ;;  %v2620_v23 = vmul.f32 %v3742_v39, %v4984_v22 }
 0x4e7   :  { %v2649_v36 = vadd.f32 %v4839_v7, %v2633_v15  ;;  %v2619_v5 = vmul.f32 %v3744_v58, %v4987_v40 }
 0x4e8   :  { %2667 = vst.msk [vmem:[#allocation5 + $0x1b8] sm:$0xff] %vm64_vm0, %v2650_v3  ;;  %v2636_v21 = vmul.f32 %v4832_v43, %v2620_v23 }
 0x4e9   :  { %2666 = vst.msk [vmem:[#allocation5 + $0x198] sm:$0xff] %vm64_vm0, %v2649_v36  ;;  %v2635_v60 = vmul.f32 %v4832_v43, %v2619_v5 }
 0x4ea   :  { %v2652_v2 = vadd.f32 %v4839_v7, %v2636_v21 }
 0x4eb   :  { %v2651_v24 = vadd.f32 %v4839_v7, %v2635_v60 }
 0x4ec   :  { %2669 = vst.msk [vmem:[#allocation5 + $0x1f8] sm:$0xff] %vm64_vm0, %v2652_v2 }
 0x4ed   :  { %2668 = vst.msk [vmem:[#allocation5 + $0x1d8] sm:$0xff] %vm64_vm0, %v2651_v24 }
 0x4ee   :  { %3796 = shalt.err (!%p3793_p12)
}
 0x4ef   :  { %s3797_s26 = scalar_lea.hbm %s5082_s6, 8192 }
 0x4f0   :  { %p3798_p13 = scmp.ne.s32.totalorder %s5082_s6, %s3797_s26  ;;  %p3801_p0 = scmp.lt.u32.totalorder %s3797_s26, %s5082_s6 }
 0x4f2   :  { %p3803_p1 = pnand %p3801_p0, %p3798_p13 }
 0x4f4   :  { %3806 = shalt.err (!%p3803_p1)
}
 0x4f5   :  { %2681 = dma.vmem_to_hbm [thread:$0]  %s2676_s5, 8192, %s5082_s6, [#allocation4], %s3812_s7, %s3812_s7, %s3813_s8  }
 0x4f6   :  { %3809 = dma.done.wait [#allocation4], 8192  }
 0x4f7   :  { %3810 = vsyncadd [#allocation4], 4294959104 }
 0x4f8   :  { %2685 = vsyncpa [#allocation3], 1 }
 0x4f9   :  { %2686 = vsyncpa [#allocation4], 1 }

</bundles_post_ra>
